<compile_context>
chip_gen: v7x
topology: tpu7x:2x2x1
jax: 0.10.0
libtpu: 0.0.40
codegen_flags: <defaults>
</compile_context>

<pallas_src>
import functools

import numpy as np
import jax
import jax.numpy as jnp
from jax.experimental import pallas as pl
from jax.experimental.pallas import tpu as pltpu


# --------------------------------------------------------------------------- #
# kernel
# --------------------------------------------------------------------------- #
def _token_ammformer_kernel(*refs, c, in_dim, dp, tb, n_tok, lmk, eps, has_mask):
    if has_mask:
        (x_ref, g1_ref, be1_ref, wqkv_ref, bqkv_ref, abd_ref, icnt_ref, mask_ref,
         wp_ref, bp_ref, g2_ref, be2_ref, w1_ref, bm1_ref, w2_ref, bm2_ref,
         o_ref) = refs
    else:
        (x_ref, g1_ref, be1_ref, wqkv_ref, bqkv_ref, abd_ref, icnt_ref,
         wp_ref, bp_ref, g2_ref, be2_ref, w1_ref, bm1_ref, w2_ref, bm2_ref,
         o_ref) = refs
        mask_ref = None

    f32, bf16 = jnp.float32, jnp.bfloat16
    rows = tb * n_tok

    # ---- LayerNorm1 over the input channels (f32 math) --------------------- #
    x = x_ref[...].astype(f32)                               # (rows, C)
    mu = jnp.sum(x, axis=-1, keepdims=True) * (1.0 / c)
    xc = x - mu
    var = jnp.sum(xc * xc, axis=-1, keepdims=True) * (1.0 / c)
    xn = xc * jax.lax.rsqrt(var + eps)
    xn = xn * g1_ref[...] + be1_ref[...]

    # ---- qkv projection (bf16 MXU, f32 acc); segments 128-lane aligned ----- #
    qkv = jnp.dot(xn.astype(bf16), wqkv_ref[...],
                  preferred_element_type=f32) + bqkv_ref[...]
    q = qkv[:, :dp]                                          # 1/scale folded into Wq
    kv = qkv[:, dp:]                                         # (rows, 2*Dp)
    v = qkv[:, 2 * dp:]                                      # (rows, Dp) f32 residual

    # ---- k/v landmark pooling: block-diag 0/1 sum + exact f32 1/count ------ #
    pool = jnp.dot(abd_ref[...], kv.astype(bf16),
                   preferred_element_type=f32) * icnt_ref[...]   # (tb*L, 2*Dp)
    kl = pool[:, :dp]
    vl = pool[:, dp:]

    # ---- attention over landmarks ------------------------------------------ #
    attn = jax.lax.dot_general(                              # q @ kl^T, no transpose
        q.astype(bf16), kl.astype(bf16),
        dimension_numbers=(((1,), (1,)), ((), ())),
        preferred_element_type=f32)                          # (rows, tb*L)
    if has_mask:
        attn = attn + mask_ref[0]                            # (1, tb*L) user mask bias

    if tb > 1:
        # cross-batch landmark columns killed in-kernel (no DMA'd bias operand);
        # only comparisons / logical ops, cheap VPU filler under the matmuls.
        row_id = jax.lax.broadcasted_iota(jnp.int32, (rows, tb * lmk), 0)
        col_id = jax.lax.broadcasted_iota(jnp.int32, (rows, tb * lmk), 1)
        same = None
        for t in range(tb):                                  # tb <= 4, unrolled
            in_row = (row_id >= t * n_tok) & (row_id < (t + 1) * n_tok)
            in_col = (col_id >= t * lmk) & (col_id < (t + 1) * lmk)
            blk = in_row & in_col
            same = blk if same is None else (same | blk)
        attn = jnp.where(same, attn, -1e30)

    attn = attn - jnp.max(attn, axis=-1, keepdims=True)
    p = jnp.exp(attn)
    p = p * pl.reciprocal(jnp.sum(p, axis=-1, keepdims=True), approx=True)

    ctx = jnp.dot(p.astype(bf16), vl.astype(bf16), preferred_element_type=f32)
    y = jnp.dot(ctx.astype(bf16), wp_ref[...],
                preferred_element_type=f32) + bp_ref[...]
    a = v + y                                                # AMMAttention output

    # ---- LayerNorm2 over in_dim: two-pass centered, padded lanes masked ---- #
    mu2 = jnp.sum(a, axis=-1, keepdims=True) * (1.0 / in_dim)
    ac = a - mu2
    if dp != in_dim:
        lane = jax.lax.broadcasted_iota(jnp.int32, (rows, dp), 1)
        ac = jnp.where(lane < in_dim, ac, 0.0)               # exact zero on pad lanes
    var2 = jnp.sum(ac * ac, axis=-1, keepdims=True) * (1.0 / in_dim)
    an = ac * jax.lax.rsqrt(var2 + eps)
    an = an * g2_ref[...] + be2_ref[...]

    # ---- MLP ---------------------------------------------------------------- #
    h = jnp.dot(an.astype(bf16), w1_ref[...],
                preferred_element_type=f32) + bm1_ref[...]
    # TODO(synk): PyTorch nn.GELU defaults to the exact erf form; tanh
    # approximation kept because lax.erf has no guaranteed Mosaic lowering.
    h = jax.nn.gelu(h, approximate=True)
    m = jnp.dot(h.astype(bf16), w2_ref[...],
                preferred_element_type=f32) + bm2_ref[...]

    # store only the valid in_dim columns (no post-call slice pass over HBM)
    o_ref[...] = (a + m)[:, :in_dim].astype(o_ref.dtype)


# --------------------------------------------------------------------------- #
# host-side helpers
# --------------------------------------------------------------------------- #
def _round_up(v, m):
    return (v + m - 1) // m * m


def _make_seg_matrix(N, landmarks):
    """0/1 pooling matrix A (landmarks, N) and per-landmark segment sizes."""
    segs = N // landmarks
    A = np.zeros((landmarks, N), np.float32)
    counts = np.zeros((landmarks,), np.float32)
    if N % landmarks == 0:
        for li in range(landmarks):
            A[li, li * segs:(li + 1) * segs] = 1.0
            counts[li] = segs
    else:
        num_k = (segs + 1) * landmarks - N
        idx = 0
        for li in range(landmarks):
            size = segs if li < num_k else segs + 1
            A[li, idx:idx + size] = 1.0
            counts[li] = size
            idx += size
    return A, counts


def _pick_tb(B, N, target_rows=512, max_tb=4):
    """Batch tile: divisor of B, rows 8-aligned (or full array), TB capped at
    max_tb (attention / pooling cost grows O(TB^2)), and G = B // TB >= 2
    whenever possible so ('parallel',) can use both v7x TensorCores."""
    cands = [tb for tb in range(1, B + 1)
             if B % tb == 0 and ((tb * N) % 8 == 0 or tb == B)]
    pref = [tb for tb in cands if tb <= max_tb and (B // tb) >= 2]
    if not pref:
        pref = [tb for tb in cands if tb <= max_tb] or cands
    best = pref[0]
    for tb in pref:
        best = tb
        if tb * N >= target_rows:
            break
    return best


def _vmem_limit_bytes():
    """~3/4 of physical VMEM (v5e/v6e 128 MiB -> 96 MiB, v7x 64 MiB -> 48 MiB)."""
    try:
        cap = int(pltpu.get_tpu_info().vmem_capacity_bytes)
    except Exception:
        cap = 64 << 20      # conservative default (safe on v7x)
    return max(32 << 20, (cap * 3) // 4)


def token_ammformer(x, params, *, num_heads, in_dim, landmarks, attn_mask=None,
                    eps=1e-5):
    """Fused Token_ammformer forward (LN1 -> AMMAttention -> + MLP(LN2)).

    Linear weights in `params` are stored pre-transposed as (in, out).
    """
    B, N, C = x.shape
    assert num_heads == 1, "module shapes are only consistent for num_heads == 1"
    L = landmarks
    assert L <= N
    hidden = params["w1"].shape[1]

    scale = float((C // num_heads) ** 0.5)
    Dp = _round_up(in_dim, 128)
    Hp = _round_up(hidden, 128)
    TB = _pick_tb(B, N)
    G = B // TB
    rows = TB * N
    f32, bf16 = jnp.float32, jnp.bfloat16

    # ---- padded / pre-laid-out weights (one-time layout plumbing) ---------- #
    # TODO(synk): on v7x the MXU also takes fp8 weights (bf16 activations, f32
    # accumulation), which would halve weight DMA/VMEM; kept bf16 for portability.
    wqkv = params["wqkv"].astype(f32)
    bqkv = params["bqkv"].astype(f32).reshape(1, 3 * in_dim)
    wqkv_p = jnp.zeros((C, 3 * Dp), f32)
    bqkv_p = jnp.zeros((1, 3 * Dp), f32)
    seg_scale = (1.0 / scale, 1.0, 1.0)        # fold 1/sqrt(head_dim) into q seg
    for s in range(3):
        wqkv_p = wqkv_p.at[:, s * Dp:s * Dp + in_dim].set(
            wqkv[:, s * in_dim:(s + 1) * in_dim] * seg_scale[s])
        bqkv_p = bqkv_p.at[:, s * Dp:s * Dp + in_dim].set(
            bqkv[:, s * in_dim:(s + 1) * in_dim] * seg_scale[s])
    wqkv_b = wqkv_p.astype(bf16)

    def pad2(w, r, c_):
        out = jnp.zeros((r, c_), f32)
        return out.at[:w.shape[0], :w.shape[1]].set(w.astype(f32))

    def pad_row(v_, c_):
        out = jnp.zeros((1, c_), f32)
        return out.at[0, :v_.shape[-1]].set(v_.astype(f32).reshape(-1))

    g1 = params["g1"].astype(f32).reshape(1, C)
    be1 = params["b1"].astype(f32).reshape(1, C)
    wproj_p = pad2(params["wproj"], Dp, Dp).astype(bf16)
    bproj_p = pad_row(params["bproj"], Dp)
    g2_p = pad_row(params["g2"], Dp)
    be2_p = pad_row(params["b2"], Dp)
    w1_p = pad2(params["w1"], Dp, Hp).astype(bf16)
    bm1_p = pad_row(params["bm1"], Hp)
    w2_p = pad2(params["w2"], Hp, Dp).astype(bf16)
    bm2_p = pad_row(params["bm2"], Dp)

    # block-diagonal 0/1 pooling matrix (exact in bf16) + exact f32 1/counts
    A01, counts = _make_seg_matrix(N, L)
    abd = jnp.asarray(np.kron(np.eye(TB, dtype=np.float32), A01)).astype(bf16)
    inv_cnt = jnp.asarray(np.tile(1.0 / counts, TB).reshape(TB * L, 1)
                          .astype(np.float32))

    # optional user mask -> tiny additive bias, one row per grid step
    has_mask = attn_mask is not None
    if has_mask:
        mcols = attn_mask.astype(f32)[:, :L].reshape(G, 1, TB * L)
        mask_bias = -1e9 * (1.0 - mcols)

    # input slab: bf16 (half the DMA) whenever the bf16 (16,128) sublane rule
    # allows it; LN1 math is still f32 inside the kernel.
    x_bf16_ok = (rows % 16 == 0) or (G == 1)
    x2 = x.reshape(B * N, C).astype(bf16 if x_bf16_ok else f32)

    kernel = functools.partial(
        _token_ammformer_kernel,
        c=C, in_dim=in_dim, dp=Dp, tb=TB, n_tok=N, lmk=L, eps=eps,
        has_mask=has_mask)

    flops = (2 * B * N * (C * 3 * Dp + Dp * Dp + 2 * Dp * Hp)
             + 4 * B * N * TB * L * Dp          # pooling
             + 4 * B * N * TB * L * Dp)         # attn + ctx
    bytes_accessed = int(x2.size * x2.dtype.itemsize + 4 * B * N * in_dim
                         + 2 * (wqkv_b.size + wproj_p.size + w1_p.size + w2_p.size))
    cost = pl.CostEstimate(flops=int(flops),
                           transcendentals=int(B * N * (TB * L + Hp)),
                           bytes_accessed=bytes_accessed)

    def _build(single_buffer_consts):
        def cspec(shape):
            if single_buffer_consts:
                # constant block index -> double-buffering only wastes VMEM
                return pl.BlockSpec(shape, lambda g: (0, 0),
                                    pipeline_mode=pl.Buffered(1))
            return pl.BlockSpec(shape, lambda g: (0, 0))

        in_specs = [
            pl.BlockSpec((rows, C), lambda g: (g, 0)),        # x rows
            cspec((1, C)), cspec((1, C)),                     # LN1 gamma / beta
            cspec((C, 3 * Dp)), cspec((1, 3 * Dp)),           # Wqkv / bqkv
            cspec((TB * L, rows)), cspec((TB * L, 1)),        # pooling / 1/counts
        ]
        operands = [x2, g1, be1, wqkv_b, bqkv_p, abd, inv_cnt]
        if has_mask:
            in_specs.append(pl.BlockSpec((1, 1, TB * L), lambda g: (g, 0, 0)))
            operands.append(mask_bias)
        in_specs += [
            cspec((Dp, Dp)), cspec((1, Dp)),                  # Wproj / bproj
            cspec((1, Dp)), cspec((1, Dp)),                   # LN2 gamma / beta
            cspec((Dp, Hp)), cspec((1, Hp)),                  # W1 / b1
            cspec((Hp, Dp)), cspec((1, Dp)),                  # W2 / b2
        ]
        operands += [wproj_p, bproj_p, g2_p, be2_p, w1_p, bm1_p, w2_p, bm2_p]

        call = pl.pallas_call(
            kernel,
            out_shape=jax.ShapeDtypeStruct((B * N, in_dim), x.dtype),
            grid_spec=pltpu.PrefetchScalarGridSpec(
                num_scalar_prefetch=0,
                grid=(G,),
                in_specs=in_specs,
                out_specs=pl.BlockSpec((rows, in_dim), lambda g: (g, 0)),
            ),
            compiler_params=pltpu.CompilerParams(
                dimension_semantics=("parallel",),
                vmem_limit_bytes=_vmem_limit_bytes()),
            cost_estimate=cost,
        )
        return call, operands

    # TODO(synk): for very large N (T2T first stage, N~3136) the full
    # (rows, 3*Dp)/(rows, Hp) f32 intermediates may not fit v7x's 64 MiB VMEM;
    # an inner pltpu.emit_pipeline over row chunks (whole batches per chunk so
    # the landmark pooling stays intact) would be the next step.
    try:
        call, operands = _build(True)
        out = call(*operands)
        out.block_until_ready()
    except Exception:
        # pipeline_mode=pl.Buffered(1) not supported on this jax/libtpu combo;
        # retry with default double-buffered constant operands.
        call, operands = _build(False)
        out = call(*operands)

    return out.reshape(B, N, in_dim)


# --------------------------------------------------------------------------- #
# pure-JAX reference (mirror of the PyTorch forward) for validation
# --------------------------------------------------------------------------- #
def token_ammformer_reference(x, params, *, num_heads, in_dim, landmarks,
                              attn_mask=None, eps=1e-5):
    B, N, C = x.shape

    def layer_norm(z, g, b):
        mu = z.mean(-1, keepdims=True)
        var = ((z - mu) ** 2).mean(-1, keepdims=True)
        return (z - mu) / jnp.sqrt(var + eps) * g + b

    # --- AMMAttention(LayerNorm1(x)) ----------------------------------------
    x1 = layer_norm(x, params["g1"], params["b1"])
    scale = (C // num_heads) ** 0.5
    qkv = (x1 @ params["wqkv"] + params["bqkv"]).reshape(
        B, N, 3, num_heads, in_dim).transpose(2, 0, 3, 1, 4)
    q, k, v = qkv[0], qkv[1], qkv[2]
    q = q / scale
    segs = N // landmarks
    if N % landmarks == 0:
        kl = k.reshape(B, num_heads, landmarks, segs, in_dim).mean(-2)
        vl = v.reshape(B, num_heads, landmarks, segs, in_dim).mean(-2)
    else:
        num_k = (segs + 1) * landmarks - N
        klf = k[:, :, :num_k * segs].reshape(B, num_heads, num_k, segs, in_dim).mean(-2)
        kll = k[:, :, num_k * segs:].reshape(B, num_heads, landmarks - num_k,
                                             segs + 1, in_dim).mean(-2)
        kl = jnp.concatenate((klf, kll), axis=-2)
        vlf = v[:, :, :num_k * segs].reshape(B, num_heads, num_k, segs, in_dim).mean(-2)
        vll = v[:, :, num_k * segs:].reshape(B, num_heads, landmarks - num_k,
                                             segs + 1, in_dim).mean(-2)
        vl = jnp.concatenate((vlf, vll), axis=-2)
    attn = q @ jnp.swapaxes(kl, -1, -2)
    if attn_mask is None:
        attn = jax.nn.softmax(attn, axis=-1)
    else:
        attn = jax.nn.softmax(
            attn - 1e9 * (1.0 - attn_mask[:, None, None, :landmarks]), axis=-1)
    a = attn @ vl
    a = jnp.swapaxes(a, 1, 2).reshape(B, N, in_dim)
    a = a @ params["wproj"] + params["bproj"]
    a = jnp.squeeze(v, 1) + a

    # --- residual MLP ---------------------------------------------------------
    h = layer_norm(a, params["g2"], params["b2"])
    h = jax.nn.gelu(h @ params["w1"] + params["bm1"], approximate=True)
    m = h @ params["w2"] + params["bm2"]
    return a + m


# --------------------------------------------------------------------------- #
# main
# --------------------------------------------------------------------------- #
if __name__ == "__main__":
    # Shapes consistent with the T2T token stage at toy size:
    # dim=32, in_dim=64, num_heads=1, num_landmarks=4, mlp_ratio=1.0.
    N, dim = 8, 32
    num_heads, in_dim = 1, 64
    hidden = int(in_dim * 1.0)

    key = jax.random.PRNGKey(0)
    ks = jax.random.split(key, 9)
    params = {
        "g1": jnp.ones((dim,), jnp.float32),
        "b1": jnp.zeros((dim,), jnp.float32),
        "wqkv": jax.random.normal(ks[1], (dim, 3 * in_dim), jnp.float32) * 0.05,
        "bqkv": jnp.zeros((3 * in_dim,), jnp.float32),      # qkv_bias=False
        "wproj": jax.random.normal(ks[2], (in_dim, in_dim), jnp.float32) * 0.05,
        "bproj": jax.random.normal(ks[3], (in_dim,), jnp.float32) * 0.02,
        "g2": jnp.ones((in_dim,), jnp.float32),
        "b2": jnp.zeros((in_dim,), jnp.float32),
        "w1": jax.random.normal(ks[4], (in_dim, hidden), jnp.float32) * 0.05,
        "bm1": jax.random.normal(ks[5], (hidden,), jnp.float32) * 0.02,
        "w2": jax.random.normal(ks[6], (hidden, in_dim), jnp.float32) * 0.05,
        "bm2": jax.random.normal(ks[7], (in_dim,), jnp.float32) * 0.02,
    }

    # 1) unmasked path, B=2 -> TB=1, G=2 (both v7x TensorCores get a grid step)
    x = jax.random.normal(ks[0], (2, N, dim), jnp.float32)
    out = token_ammformer(x, params, num_heads=num_heads, in_dim=in_dim,
                          landmarks=4)
    jax.block_until_ready(out)
    ref = token_ammformer_reference(x, params, num_heads=num_heads,
                                    in_dim=in_dim, landmarks=4)
    np.testing.assert_allclose(np.asarray(out), np.asarray(ref),
                               rtol=5e-2, atol=5e-2)

    # 2) masked + uneven-landmark path of the inner AMMAttention (TB=1)
    mask = jnp.array([[1.0, 0.0, 1.0], [1.0, 1.0, 0.0]], jnp.float32)
    out_m = token_ammformer(x, params, num_heads=num_heads, in_dim=in_dim,
                            landmarks=3, attn_mask=mask)
    jax.block_until_ready(out_m)
    ref_m = token_ammformer_reference(x, params, num_heads=num_heads,
                                      in_dim=in_dim, landmarks=3,
                                      attn_mask=mask)
    np.testing.assert_allclose(np.asarray(out_m), np.asarray(ref_m),
                               rtol=5e-2, atol=5e-2)

    # 3) B=4 -> TB=2: exercises the in-kernel cross-batch landmark kill and the
    #    bf16 input-slab path (rows=16 satisfies the bf16 sublane rule).
    x4 = jax.random.normal(ks[8], (4, N, dim), jnp.float32)
    out_4 = token_ammformer(x4, params, num_heads=num_heads, in_dim=in_dim,
                            landmarks=4)
    jax.block_until_ready(out_4)
    ref_4 = token_ammformer_reference(x4, params, num_heads=num_heads,
                                      in_dim=in_dim, landmarks=4)
    np.testing.assert_allclose(np.asarray(out_4), np.asarray(ref_4),
                               rtol=5e-2, atol=5e-2)

    print("KERNEL_OK")
</pallas_src>

<mosaic_0001>
module attributes {stable_mosaic.version = 11 : i64} {
  func.func @_token_ammformer_kernel(%arg0: i32, %arg1: memref<8x32xf32, #tpu.memory_space<vmem>>, %arg2: memref<1x32xf32, #tpu.memory_space<vmem>>, %arg3: memref<1x32xf32, #tpu.memory_space<vmem>>, %arg4: memref<32x384xbf16, #tpu.memory_space<vmem>>, %arg5: memref<1x384xf32, #tpu.memory_space<vmem>>, %arg6: memref<4x8xbf16, #tpu.memory_space<vmem>>, %arg7: memref<4x1xf32, #tpu.memory_space<vmem>>, %arg8: memref<128x128xbf16, #tpu.memory_space<vmem>>, %arg9: memref<1x128xf32, #tpu.memory_space<vmem>>, %arg10: memref<1x128xf32, #tpu.memory_space<vmem>>, %arg11: memref<1x128xf32, #tpu.memory_space<vmem>>, %arg12: memref<128x128xbf16, #tpu.memory_space<vmem>>, %arg13: memref<1x128xf32, #tpu.memory_space<vmem>>, %arg14: memref<128x128xbf16, #tpu.memory_space<vmem>>, %arg15: memref<1x128xf32, #tpu.memory_space<vmem>>, %arg16: memref<8x64xf32, #tpu.memory_space<vmem>>) attributes {dimension_semantics = [#tpu.dimension_semantics<parallel>], iteration_bounds = array<i64: 2>, scalar_prefetch = 0 : i64, scratch_operands = 0 : i64, tpu.core_type = #tpu.core_type<tc>, window_params = [{transform_indices = @transform_0, window_bounds = array<i64: 8, 32>}, {pipeline_mode = #tpu.pipeline_mode<synchronous>, transform_indices = @transform_1, window_bounds = array<i64: 1, 32>}, {pipeline_mode = #tpu.pipeline_mode<synchronous>, transform_indices = @transform_2, window_bounds = array<i64: 1, 32>}, {pipeline_mode = #tpu.pipeline_mode<synchronous>, transform_indices = @transform_3, window_bounds = array<i64: 32, 384>}, {pipeline_mode = #tpu.pipeline_mode<synchronous>, transform_indices = @transform_4, window_bounds = array<i64: 1, 384>}, {pipeline_mode = #tpu.pipeline_mode<synchronous>, transform_indices = @transform_5, window_bounds = array<i64: 4, 8>}, {pipeline_mode = #tpu.pipeline_mode<synchronous>, transform_indices = @transform_6, window_bounds = array<i64: 4, 1>}, {pipeline_mode = #tpu.pipeline_mode<synchronous>, transform_indices = @transform_7, window_bounds = array<i64: 128, 128>}, {pipeline_mode = #tpu.pipeline_mode<synchronous>, transform_indices = @transform_8, window_bounds = array<i64: 1, 128>}, {pipeline_mode = #tpu.pipeline_mode<synchronous>, transform_indices = @transform_9, window_bounds = array<i64: 1, 128>}, {pipeline_mode = #tpu.pipeline_mode<synchronous>, transform_indices = @transform_10, window_bounds = array<i64: 1, 128>}, {pipeline_mode = #tpu.pipeline_mode<synchronous>, transform_indices = @transform_11, window_bounds = array<i64: 128, 128>}, {pipeline_mode = #tpu.pipeline_mode<synchronous>, transform_indices = @transform_12, window_bounds = array<i64: 1, 128>}, {pipeline_mode = #tpu.pipeline_mode<synchronous>, transform_indices = @transform_13, window_bounds = array<i64: 128, 128>}, {pipeline_mode = #tpu.pipeline_mode<synchronous>, transform_indices = @transform_14, window_bounds = array<i64: 1, 128>}, {transform_indices = @transform_15, window_bounds = array<i64: 8, 64>}]} {
    %c0 = arith.constant 0 : index
    %c0_0 = arith.constant 0 : index
    %0 = vector.load %arg1[%c0, %c0_0] : memref<8x32xf32, #tpu.memory_space<vmem>>, vector<8x32xf32>
    %cst = arith.constant dense<0.000000e+00> : vector<8xf32>
    %1 = vector.multi_reduction <add>, %0, %cst [1] : vector<8x32xf32> to vector<8xf32>
    %2 = vector.shape_cast %1 : vector<8xf32> to vector<8x1xf32>
    %cst_1 = arith.constant 3.125000e-02 : f32
    %3 = vector.broadcast %cst_1 : f32 to vector<8x1xf32>
    %4 = arith.mulf %2, %3 : vector<8x1xf32>
    %5 = vector.broadcast %4 : vector<8x1xf32> to vector<8x32xf32>
    %6 = arith.subf %0, %5 : vector<8x32xf32>
    %7 = arith.mulf %6, %6 : vector<8x32xf32>
    %cst_2 = arith.constant dense<0.000000e+00> : vector<8xf32>
    %8 = vector.multi_reduction <add>, %7, %cst_2 [1] : vector<8x32xf32> to vector<8xf32>
    %9 = vector.shape_cast %8 : vector<8xf32> to vector<8x1xf32>
    %cst_3 = arith.constant 3.125000e-02 : f32
    %10 = vector.broadcast %cst_3 : f32 to vector<8x1xf32>
    %11 = arith.mulf %9, %10 : vector<8x1xf32>
    %cst_4 = arith.constant 9.99999974E-6 : f32
    %12 = vector.broadcast %cst_4 : f32 to vector<8x1xf32>
    %13 = arith.addf %11, %12 : vector<8x1xf32>
    %14 = math.rsqrt %13 : vector<8x1xf32>
    %15 = vector.broadcast %14 : vector<8x1xf32> to vector<8x32xf32>
    %16 = arith.mulf %6, %15 : vector<8x32xf32>
    %c0_5 = arith.constant 0 : index
    %c0_6 = arith.constant 0 : index
    %17 = vector.load %arg2[%c0_5, %c0_6] : memref<1x32xf32, #tpu.memory_space<vmem>>, vector<1x32xf32>
    %18 = vector.broadcast %17 : vector<1x32xf32> to vector<8x32xf32>
    %19 = arith.mulf %16, %18 : vector<8x32xf32>
    %c0_7 = arith.constant 0 : index
    %c0_8 = arith.constant 0 : index
    %20 = vector.load %arg3[%c0_7, %c0_8] : memref<1x32xf32, #tpu.memory_space<vmem>>, vector<1x32xf32>
    %21 = vector.broadcast %20 : vector<1x32xf32> to vector<8x32xf32>
    %22 = arith.addf %19, %21 : vector<8x32xf32>
    %23 = arith.truncf %22 : vector<8x32xf32> to vector<8x32xbf16>
    %c0_9 = arith.constant 0 : index
    %c0_10 = arith.constant 0 : index
    %24 = vector.load %arg4[%c0_9, %c0_10] : memref<32x384xbf16, #tpu.memory_space<vmem>>, vector<32x384xbf16>
    %cst_11 = arith.constant dense<0.000000e+00> : vector<8x384xf32>
    %25 = tpu.matmul %23, %24, %cst_11 {dimension_numbers = #tpu.dot_dimension_numbers<[1], [0], [0], [1], [0, 0, 1, 1], [], []>} : vector<8x32xbf16>, vector<32x384xbf16>, vector<8x384xf32> -> vector<8x384xf32>
    %c0_12 = arith.constant 0 : index
    %c0_13 = arith.constant 0 : index
    %26 = vector.load %arg5[%c0_12, %c0_13] : memref<1x384xf32, #tpu.memory_space<vmem>>, vector<1x384xf32>
    %27 = vector.broadcast %26 : vector<1x384xf32> to vector<8x384xf32>
    %28 = arith.addf %25, %27 : vector<8x384xf32>
    %29 = vector.extract_strided_slice %28 {offsets = [0, 0], sizes = [8, 128], strides = [1, 1]} : vector<8x384xf32> to vector<8x128xf32>
    %30 = vector.extract_strided_slice %28 {offsets = [0, 128], sizes = [8, 256], strides = [1, 1]} : vector<8x384xf32> to vector<8x256xf32>
    %31 = vector.extract_strided_slice %28 {offsets = [0, 256], sizes = [8, 128], strides = [1, 1]} : vector<8x384xf32> to vector<8x128xf32>
    %c0_14 = arith.constant 0 : index
    %c0_15 = arith.constant 0 : index
    %32 = vector.load %arg6[%c0_14, %c0_15] : memref<4x8xbf16, #tpu.memory_space<vmem>>, vector<4x8xbf16>
    %33 = arith.truncf %30 : vector<8x256xf32> to vector<8x256xbf16>
    %cst_16 = arith.constant dense<0.000000e+00> : vector<4x256xf32>
    %34 = tpu.matmul %32, %33, %cst_16 {dimension_numbers = #tpu.dot_dimension_numbers<[1], [0], [0], [1], [0, 0, 1, 1], [], []>} : vector<4x8xbf16>, vector<8x256xbf16>, vector<4x256xf32> -> vector<4x256xf32>
    %c0_17 = arith.constant 0 : index
    %c0_18 = arith.constant 0 : index
    %35 = vector.load %arg7[%c0_17, %c0_18] : memref<4x1xf32, #tpu.memory_space<vmem>>, vector<4x1xf32>
    %36 = vector.broadcast %35 : vector<4x1xf32> to vector<4x256xf32>
    %37 = arith.mulf %34, %36 : vector<4x256xf32>
    %38 = vector.extract_strided_slice %37 {offsets = [0, 0], sizes = [4, 128], strides = [1, 1]} : vector<4x256xf32> to vector<4x128xf32>
    %39 = vector.extract_strided_slice %37 {offsets = [0, 128], sizes = [4, 128], strides = [1, 1]} : vector<4x256xf32> to vector<4x128xf32>
    %40 = arith.truncf %29 : vector<8x128xf32> to vector<8x128xbf16>
    %41 = arith.truncf %38 : vector<4x128xf32> to vector<4x128xbf16>
    %cst_19 = arith.constant dense<0.000000e+00> : vector<8x4xf32>
    %42 = tpu.matmul %40, %41, %cst_19 {dimension_numbers = #tpu.dot_dimension_numbers<[1], [1], [0], [0], [0, 0, 1, 0], [], []>} : vector<8x128xbf16>, vector<4x128xbf16>, vector<8x4xf32> -> vector<8x4xf32>
    %cst_20 = arith.constant dense<0xFF800000> : vector<8xf32>
    %43 = vector.multi_reduction <maximumf>, %42, %cst_20 [1] : vector<8x4xf32> to vector<8xf32>
    %44 = vector.shape_cast %43 : vector<8xf32> to vector<8x1xf32>
    %45 = vector.broadcast %44 : vector<8x1xf32> to vector<8x4xf32>
    %46 = arith.subf %42, %45 : vector<8x4xf32>
    %47 = math.exp %46 : vector<8x4xf32>
    %cst_21 = arith.constant dense<0.000000e+00> : vector<8xf32>
    %48 = vector.multi_reduction <add>, %47, %cst_21 [1] : vector<8x4xf32> to vector<8xf32>
    %49 = vector.shape_cast %48 : vector<8xf32> to vector<8x1xf32>
    %50 = tpu.reciprocal %49 {approx = true} : vector<8x1xf32> -> vector<8x1xf32>
    %51 = vector.broadcast %50 : vector<8x1xf32> to vector<8x4xf32>
    %52 = arith.mulf %47, %51 : vector<8x4xf32>
    %53 = arith.truncf %52 : vector<8x4xf32> to vector<8x4xbf16>
    %54 = arith.truncf %39 : vector<4x128xf32> to vector<4x128xbf16>
    %cst_22 = arith.constant dense<0.000000e+00> : vector<8x128xf32>
    %55 = tpu.matmul %53, %54, %cst_22 {dimension_numbers = #tpu.dot_dimension_numbers<[1], [0], [0], [1], [0, 0, 1, 1], [], []>} : vector<8x4xbf16>, vector<4x128xbf16>, vector<8x128xf32> -> vector<8x128xf32>
    %56 = arith.truncf %55 : vector<8x128xf32> to vector<8x128xbf16>
    %c0_23 = arith.constant 0 : index
    %c0_24 = arith.constant 0 : index
    %57 = vector.load %arg8[%c0_23, %c0_24] : memref<128x128xbf16, #tpu.memory_space<vmem>>, vector<128x128xbf16>
    %cst_25 = arith.constant dense<0.000000e+00> : vector<8x128xf32>
    %58 = tpu.matmul %56, %57, %cst_25 {dimension_numbers = #tpu.dot_dimension_numbers<[1], [0], [0], [1], [0, 0, 1, 1], [], []>} : vector<8x128xbf16>, vector<128x128xbf16>, vector<8x128xf32> -> vector<8x128xf32>
    %c0_26 = arith.constant 0 : index
    %c0_27 = arith.constant 0 : index
    %59 = vector.load %arg9[%c0_26, %c0_27] : memref<1x128xf32, #tpu.memory_space<vmem>>, vector<1x128xf32>
    %60 = vector.broadcast %59 : vector<1x128xf32> to vector<8x128xf32>
    %61 = arith.addf %58, %60 : vector<8x128xf32>
    %62 = arith.addf %31, %61 : vector<8x128xf32>
    %cst_28 = arith.constant dense<0.000000e+00> : vector<8xf32>
    %63 = vector.multi_reduction <add>, %62, %cst_28 [1] : vector<8x128xf32> to vector<8xf32>
    %64 = vector.shape_cast %63 : vector<8xf32> to vector<8x1xf32>
    %cst_29 = arith.constant 1.562500e-02 : f32
    %65 = vector.broadcast %cst_29 : f32 to vector<8x1xf32>
    %66 = arith.mulf %64, %65 : vector<8x1xf32>
    %67 = vector.broadcast %66 : vector<8x1xf32> to vector<8x128xf32>
    %68 = arith.subf %62, %67 : vector<8x128xf32>
    %69 = tpu.iota {dimensions = array<i32: 1>} : vector<8x128xi32>
    %c64_i32 = arith.constant 64 : i32
    %70 = vector.broadcast %c64_i32 : i32 to vector<8x128xi32>
    %71 = arith.cmpi slt, %69, %70 : vector<8x128xi32>
    %cst_30 = arith.constant 0.000000e+00 : f32
    %72 = vector.broadcast %cst_30 : f32 to vector<8x128xf32>
    %73 = arith.select %71, %68, %72 : vector<8x128xi1>, vector<8x128xf32>
    %74 = arith.mulf %73, %73 : vector<8x128xf32>
    %cst_31 = arith.constant dense<0.000000e+00> : vector<8xf32>
    %75 = vector.multi_reduction <add>, %74, %cst_31 [1] : vector<8x128xf32> to vector<8xf32>
    %76 = vector.shape_cast %75 : vector<8xf32> to vector<8x1xf32>
    %cst_32 = arith.constant 1.562500e-02 : f32
    %77 = vector.broadcast %cst_32 : f32 to vector<8x1xf32>
    %78 = arith.mulf %76, %77 : vector<8x1xf32>
    %cst_33 = arith.constant 9.99999974E-6 : f32
    %79 = vector.broadcast %cst_33 : f32 to vector<8x1xf32>
    %80 = arith.addf %78, %79 : vector<8x1xf32>
    %81 = math.rsqrt %80 : vector<8x1xf32>
    %82 = vector.broadcast %81 : vector<8x1xf32> to vector<8x128xf32>
    %83 = arith.mulf %73, %82 : vector<8x128xf32>
    %c0_34 = arith.constant 0 : index
    %c0_35 = arith.constant 0 : index
    %84 = vector.load %arg10[%c0_34, %c0_35] : memref<1x128xf32, #tpu.memory_space<vmem>>, vector<1x128xf32>
    %85 = vector.broadcast %84 : vector<1x128xf32> to vector<8x128xf32>
    %86 = arith.mulf %83, %85 : vector<8x128xf32>
    %c0_36 = arith.constant 0 : index
    %c0_37 = arith.constant 0 : index
    %87 = vector.load %arg11[%c0_36, %c0_37] : memref<1x128xf32, #tpu.memory_space<vmem>>, vector<1x128xf32>
    %88 = vector.broadcast %87 : vector<1x128xf32> to vector<8x128xf32>
    %89 = arith.addf %86, %88 : vector<8x128xf32>
    %90 = arith.truncf %89 : vector<8x128xf32> to vector<8x128xbf16>
    %c0_38 = arith.constant 0 : index
    %c0_39 = arith.constant 0 : index
    %91 = vector.load %arg12[%c0_38, %c0_39] : memref<128x128xbf16, #tpu.memory_space<vmem>>, vector<128x128xbf16>
    %cst_40 = arith.constant dense<0.000000e+00> : vector<8x128xf32>
    %92 = tpu.matmul %90, %91, %cst_40 {dimension_numbers = #tpu.dot_dimension_numbers<[1], [0], [0], [1], [0, 0, 1, 1], [], []>} : vector<8x128xbf16>, vector<128x128xbf16>, vector<8x128xf32> -> vector<8x128xf32>
    %c0_41 = arith.constant 0 : index
    %c0_42 = arith.constant 0 : index
    %93 = vector.load %arg13[%c0_41, %c0_42] : memref<1x128xf32, #tpu.memory_space<vmem>>, vector<1x128xf32>
    %94 = vector.broadcast %93 : vector<1x128xf32> to vector<8x128xf32>
    %95 = arith.addf %92, %94 : vector<8x128xf32>
    %96 = arith.mulf %95, %95 : vector<8x128xf32>
    %97 = arith.mulf %95, %96 : vector<8x128xf32>
    %cst_43 = arith.constant 4.471500e-02 : f32
    %98 = vector.broadcast %cst_43 : f32 to vector<8x128xf32>
    %99 = arith.mulf %98, %97 : vector<8x128xf32>
    %100 = arith.addf %95, %99 : vector<8x128xf32>
    %cst_44 = arith.constant 0.797884583 : f32
    %101 = vector.broadcast %cst_44 : f32 to vector<8x128xf32>
    %102 = arith.mulf %101, %100 : vector<8x128xf32>
    %103 = math.tanh %102 : vector<8x128xf32>
    %cst_45 = arith.constant 1.000000e+00 : f32
    %104 = vector.broadcast %cst_45 : f32 to vector<8x128xf32>
    %105 = arith.addf %104, %103 : vector<8x128xf32>
    %cst_46 = arith.constant 5.000000e-01 : f32
    %106 = vector.broadcast %cst_46 : f32 to vector<8x128xf32>
    %107 = arith.mulf %106, %105 : vector<8x128xf32>
    %108 = arith.mulf %95, %107 : vector<8x128xf32>
    %109 = arith.truncf %108 : vector<8x128xf32> to vector<8x128xbf16>
    %c0_47 = arith.constant 0 : index
    %c0_48 = arith.constant 0 : index
    %110 = vector.load %arg14[%c0_47, %c0_48] : memref<128x128xbf16, #tpu.memory_space<vmem>>, vector<128x128xbf16>
    %cst_49 = arith.constant dense<0.000000e+00> : vector<8x128xf32>
    %111 = tpu.matmul %109, %110, %cst_49 {dimension_numbers = #tpu.dot_dimension_numbers<[1], [0], [0], [1], [0, 0, 1, 1], [], []>} : vector<8x128xbf16>, vector<128x128xbf16>, vector<8x128xf32> -> vector<8x128xf32>
    %c0_50 = arith.constant 0 : index
    %c0_51 = arith.constant 0 : index
    %112 = vector.load %arg15[%c0_50, %c0_51] : memref<1x128xf32, #tpu.memory_space<vmem>>, vector<1x128xf32>
    %113 = vector.broadcast %112 : vector<1x128xf32> to vector<8x128xf32>
    %114 = arith.addf %111, %113 : vector<8x128xf32>
    %115 = arith.addf %62, %114 : vector<8x128xf32>
    %116 = vector.extract_strided_slice %115 {offsets = [0, 0], sizes = [8, 64], strides = [1, 1]} : vector<8x128xf32> to vector<8x64xf32>
    %c0_52 = arith.constant 0 : index
    %c0_53 = arith.constant 0 : index
    %117 = vector.load %arg16[%c0_52, %c0_53] : memref<8x64xf32, #tpu.memory_space<vmem>>, vector<8x64xf32>
    tpu.vector_store %arg16[%c0_52, %c0_53], %116 {strides = array<i32>} : memref<8x64xf32, #tpu.memory_space<vmem>>, vector<8x64xf32>,
    return
  }
  func.func @transform_0(%arg0: i32) -> (i32, i32) {
    %c0_i32 = arith.constant 0 : i32
    %c0_i32_0 = arith.constant 0 : i32
    return %arg0, %c0_i32 : i32, i32
  }
  func.func @transform_1(%arg0: i32) -> (i32, i32) {
    %c0_i32 = arith.constant 0 : i32
    %c0_i32_0 = arith.constant 0 : i32
    %c0_i32_1 = arith.constant 0 : i32
    return %c0_i32, %c0_i32_0 : i32, i32
  }
  func.func @transform_2(%arg0: i32) -> (i32, i32) {
    %c0_i32 = arith.constant 0 : i32
    %c0_i32_0 = arith.constant 0 : i32
    %c0_i32_1 = arith.constant 0 : i32
    return %c0_i32, %c0_i32_0 : i32, i32
  }
  func.func @transform_3(%arg0: i32) -> (i32, i32) {
    %c0_i32 = arith.constant 0 : i32
    %c0_i32_0 = arith.constant 0 : i32
    %c0_i32_1 = arith.constant 0 : i32
    return %c0_i32, %c0_i32_0 : i32, i32
  }
  func.func @transform_4(%arg0: i32) -> (i32, i32) {
    %c0_i32 = arith.constant 0 : i32
    %c0_i32_0 = arith.constant 0 : i32
    %c0_i32_1 = arith.constant 0 : i32
    return %c0_i32, %c0_i32_0 : i32, i32
  }
  func.func @transform_5(%arg0: i32) -> (i32, i32) {
    %c0_i32 = arith.constant 0 : i32
    %c0_i32_0 = arith.constant 0 : i32
    %c0_i32_1 = arith.constant 0 : i32
    return %c0_i32, %c0_i32_0 : i32, i32
  }
  func.func @transform_6(%arg0: i32) -> (i32, i32) {
    %c0_i32 = arith.constant 0 : i32
    %c0_i32_0 = arith.constant 0 : i32
    %c0_i32_1 = arith.constant 0 : i32
    return %c0_i32, %c0_i32_0 : i32, i32
  }
  func.func @transform_7(%arg0: i32) -> (i32, i32) {
    %c0_i32 = arith.constant 0 : i32
    %c0_i32_0 = arith.constant 0 : i32
    %c0_i32_1 = arith.constant 0 : i32
    return %c0_i32, %c0_i32_0 : i32, i32
  }
  func.func @transform_8(%arg0: i32) -> (i32, i32) {
    %c0_i32 = arith.constant 0 : i32
    %c0_i32_0 = arith.constant 0 : i32
    %c0_i32_1 = arith.constant 0 : i32
    return %c0_i32, %c0_i32_0 : i32, i32
  }
  func.func @transform_9(%arg0: i32) -> (i32, i32) {
    %c0_i32 = arith.constant 0 : i32
    %c0_i32_0 = arith.constant 0 : i32
    %c0_i32_1 = arith.constant 0 : i32
    return %c0_i32, %c0_i32_0 : i32, i32
  }
  func.func @transform_10(%arg0: i32) -> (i32, i32) {
    %c0_i32 = arith.constant 0 : i32
    %c0_i32_0 = arith.constant 0 : i32
    %c0_i32_1 = arith.constant 0 : i32
    return %c0_i32, %c0_i32_0 : i32, i32
  }
  func.func @transform_11(%arg0: i32) -> (i32, i32) {
    %c0_i32 = arith.constant 0 : i32
    %c0_i32_0 = arith.constant 0 : i32
    %c0_i32_1 = arith.constant 0 : i32
    return %c0_i32, %c0_i32_0 : i32, i32
  }
  func.func @transform_12(%arg0: i32) -> (i32, i32) {
    %c0_i32 = arith.constant 0 : i32
    %c0_i32_0 = arith.constant 0 : i32
    %c0_i32_1 = arith.constant 0 : i32
    return %c0_i32, %c0_i32_0 : i32, i32
  }
  func.func @transform_13(%arg0: i32) -> (i32, i32) {
    %c0_i32 = arith.constant 0 : i32
    %c0_i32_0 = arith.constant 0 : i32
    %c0_i32_1 = arith.constant 0 : i32
    return %c0_i32, %c0_i32_0 : i32, i32
  }
  func.func @transform_14(%arg0: i32) -> (i32, i32) {
    %c0_i32 = arith.constant 0 : i32
    %c0_i32_0 = arith.constant 0 : i32
    %c0_i32_1 = arith.constant 0 : i32
    return %c0_i32, %c0_i32_0 : i32, i32
  }
  func.func @transform_15(%arg0: i32) -> (i32, i32) {
    %c0_i32 = arith.constant 0 : i32
    %c0_i32_0 = arith.constant 0 : i32
    return %arg0, %c0_i32 : i32, i32
  }
}

module attributes {stable_mosaic.version = 11 : i64} {
  func.func @_token_ammformer_kernel(%arg0: i32, %arg1: memref<8x32xf32, #tpu.memory_space<vmem>>, %arg2: memref<1x32xf32, #tpu.memory_space<vmem>>, %arg3: memref<1x32xf32, #tpu.memory_space<vmem>>, %arg4: memref<32x384xbf16, #tpu.memory_space<vmem>>, %arg5: memref<1x384xf32, #tpu.memory_space<vmem>>, %arg6: memref<4x8xbf16, #tpu.memory_space<vmem>>, %arg7: memref<4x1xf32, #tpu.memory_space<vmem>>, %arg8: memref<128x128xbf16, #tpu.memory_space<vmem>>, %arg9: memref<1x128xf32, #tpu.memory_space<vmem>>, %arg10: memref<1x128xf32, #tpu.memory_space<vmem>>, %arg11: memref<1x128xf32, #tpu.memory_space<vmem>>, %arg12: memref<128x128xbf16, #tpu.memory_space<vmem>>, %arg13: memref<1x128xf32, #tpu.memory_space<vmem>>, %arg14: memref<128x128xbf16, #tpu.memory_space<vmem>>, %arg15: memref<1x128xf32, #tpu.memory_space<vmem>>, %arg16: memref<8x64xf32, #tpu.memory_space<vmem>>) attributes {dimension_semantics = [#tpu.dimension_semantics<parallel>], iteration_bounds = array<i64: 2>, scalar_prefetch = 0 : i64, scratch_operands = 0 : i64, tpu.core_type = #tpu.core_type<tc>, window_params = [{transform_indices = @transform_0, window_bounds = array<i64: 8, 32>}, {pipeline_mode = #tpu.pipeline_mode<synchronous>, transform_indices = @transform_1, window_bounds = array<i64: 1, 32>}, {pipeline_mode = #tpu.pipeline_mode<synchronous>, transform_indices = @transform_2, window_bounds = array<i64: 1, 32>}, {pipeline_mode = #tpu.pipeline_mode<synchronous>, transform_indices = @transform_3, window_bounds = array<i64: 32, 384>}, {pipeline_mode = #tpu.pipeline_mode<synchronous>, transform_indices = @transform_4, window_bounds = array<i64: 1, 384>}, {pipeline_mode = #tpu.pipeline_mode<synchronous>, transform_indices = @transform_5, window_bounds = array<i64: 4, 8>}, {pipeline_mode = #tpu.pipeline_mode<synchronous>, transform_indices = @transform_6, window_bounds = array<i64: 4, 1>}, {pipeline_mode = #tpu.pipeline_mode<synchronous>, transform_indices = @transform_7, window_bounds = array<i64: 128, 128>}, {pipeline_mode = #tpu.pipeline_mode<synchronous>, transform_indices = @transform_8, window_bounds = array<i64: 1, 128>}, {pipeline_mode = #tpu.pipeline_mode<synchronous>, transform_indices = @transform_9, window_bounds = array<i64: 1, 128>}, {pipeline_mode = #tpu.pipeline_mode<synchronous>, transform_indices = @transform_10, window_bounds = array<i64: 1, 128>}, {pipeline_mode = #tpu.pipeline_mode<synchronous>, transform_indices = @transform_11, window_bounds = array<i64: 128, 128>}, {pipeline_mode = #tpu.pipeline_mode<synchronous>, transform_indices = @transform_12, window_bounds = array<i64: 1, 128>}, {pipeline_mode = #tpu.pipeline_mode<synchronous>, transform_indices = @transform_13, window_bounds = array<i64: 128, 128>}, {pipeline_mode = #tpu.pipeline_mode<synchronous>, transform_indices = @transform_14, window_bounds = array<i64: 1, 128>}, {transform_indices = @transform_15, window_bounds = array<i64: 8, 64>}]} {
    %c0 = arith.constant 0 : index
    %c0_0 = arith.constant 0 : index
    %0 = vector.load %arg1[%c0, %c0_0] : memref<8x32xf32, #tpu.memory_space<vmem>>, vector<8x32xf32>
    %cst = arith.constant dense<0.000000e+00> : vector<8xf32>
    %1 = vector.multi_reduction <add>, %0, %cst [1] : vector<8x32xf32> to vector<8xf32>
    %2 = vector.shape_cast %1 : vector<8xf32> to vector<8x1xf32>
    %cst_1 = arith.constant 3.125000e-02 : f32
    %3 = vector.broadcast %cst_1 : f32 to vector<8x1xf32>
    %4 = arith.mulf %2, %3 : vector<8x1xf32>
    %5 = vector.broadcast %4 : vector<8x1xf32> to vector<8x32xf32>
    %6 = arith.subf %0, %5 : vector<8x32xf32>
    %7 = arith.mulf %6, %6 : vector<8x32xf32>
    %cst_2 = arith.constant dense<0.000000e+00> : vector<8xf32>
    %8 = vector.multi_reduction <add>, %7, %cst_2 [1] : vector<8x32xf32> to vector<8xf32>
    %9 = vector.shape_cast %8 : vector<8xf32> to vector<8x1xf32>
    %cst_3 = arith.constant 3.125000e-02 : f32
    %10 = vector.broadcast %cst_3 : f32 to vector<8x1xf32>
    %11 = arith.mulf %9, %10 : vector<8x1xf32>
    %cst_4 = arith.constant 9.99999974E-6 : f32
    %12 = vector.broadcast %cst_4 : f32 to vector<8x1xf32>
    %13 = arith.addf %11, %12 : vector<8x1xf32>
    %14 = math.rsqrt %13 : vector<8x1xf32>
    %15 = vector.broadcast %14 : vector<8x1xf32> to vector<8x32xf32>
    %16 = arith.mulf %6, %15 : vector<8x32xf32>
    %c0_5 = arith.constant 0 : index
    %c0_6 = arith.constant 0 : index
    %17 = vector.load %arg2[%c0_5, %c0_6] : memref<1x32xf32, #tpu.memory_space<vmem>>, vector<1x32xf32>
    %18 = vector.broadcast %17 : vector<1x32xf32> to vector<8x32xf32>
    %19 = arith.mulf %16, %18 : vector<8x32xf32>
    %c0_7 = arith.constant 0 : index
    %c0_8 = arith.constant 0 : index
    %20 = vector.load %arg3[%c0_7, %c0_8] : memref<1x32xf32, #tpu.memory_space<vmem>>, vector<1x32xf32>
    %21 = vector.broadcast %20 : vector<1x32xf32> to vector<8x32xf32>
    %22 = arith.addf %19, %21 : vector<8x32xf32>
    %23 = arith.truncf %22 : vector<8x32xf32> to vector<8x32xbf16>
    %c0_9 = arith.constant 0 : index
    %c0_10 = arith.constant 0 : index
    %24 = vector.load %arg4[%c0_9, %c0_10] : memref<32x384xbf16, #tpu.memory_space<vmem>>, vector<32x384xbf16>
    %cst_11 = arith.constant dense<0.000000e+00> : vector<8x384xf32>
    %25 = tpu.matmul %23, %24, %cst_11 {dimension_numbers = #tpu.dot_dimension_numbers<[1], [0], [0], [1], [0, 0, 1, 1], [], []>} : vector<8x32xbf16>, vector<32x384xbf16>, vector<8x384xf32> -> vector<8x384xf32>
    %c0_12 = arith.constant 0 : index
    %c0_13 = arith.constant 0 : index
    %26 = vector.load %arg5[%c0_12, %c0_13] : memref<1x384xf32, #tpu.memory_space<vmem>>, vector<1x384xf32>
    %27 = vector.broadcast %26 : vector<1x384xf32> to vector<8x384xf32>
    %28 = arith.addf %25, %27 : vector<8x384xf32>
    %29 = vector.extract_strided_slice %28 {offsets = [0, 0], sizes = [8, 128], strides = [1, 1]} : vector<8x384xf32> to vector<8x128xf32>
    %30 = vector.extract_strided_slice %28 {offsets = [0, 128], sizes = [8, 256], strides = [1, 1]} : vector<8x384xf32> to vector<8x256xf32>
    %31 = vector.extract_strided_slice %28 {offsets = [0, 256], sizes = [8, 128], strides = [1, 1]} : vector<8x384xf32> to vector<8x128xf32>
    %c0_14 = arith.constant 0 : index
    %c0_15 = arith.constant 0 : index
    %32 = vector.load %arg6[%c0_14, %c0_15] : memref<4x8xbf16, #tpu.memory_space<vmem>>, vector<4x8xbf16>
    %33 = arith.truncf %30 : vector<8x256xf32> to vector<8x256xbf16>
    %cst_16 = arith.constant dense<0.000000e+00> : vector<4x256xf32>
    %34 = tpu.matmul %32, %33, %cst_16 {dimension_numbers = #tpu.dot_dimension_numbers<[1], [0], [0], [1], [0, 0, 1, 1], [], []>} : vector<4x8xbf16>, vector<8x256xbf16>, vector<4x256xf32> -> vector<4x256xf32>
    %c0_17 = arith.constant 0 : index
    %c0_18 = arith.constant 0 : index
    %35 = vector.load %arg7[%c0_17, %c0_18] : memref<4x1xf32, #tpu.memory_space<vmem>>, vector<4x1xf32>
    %36 = vector.broadcast %35 : vector<4x1xf32> to vector<4x256xf32>
    %37 = arith.mulf %34, %36 : vector<4x256xf32>
    %38 = vector.extract_strided_slice %37 {offsets = [0, 0], sizes = [4, 128], strides = [1, 1]} : vector<4x256xf32> to vector<4x128xf32>
    %39 = vector.extract_strided_slice %37 {offsets = [0, 128], sizes = [4, 128], strides = [1, 1]} : vector<4x256xf32> to vector<4x128xf32>
    %40 = arith.truncf %29 : vector<8x128xf32> to vector<8x128xbf16>
    %41 = arith.truncf %38 : vector<4x128xf32> to vector<4x128xbf16>
    %cst_19 = arith.constant dense<0.000000e+00> : vector<8x4xf32>
    %42 = tpu.matmul %40, %41, %cst_19 {dimension_numbers = #tpu.dot_dimension_numbers<[1], [1], [0], [0], [0, 0, 1, 0], [], []>} : vector<8x128xbf16>, vector<4x128xbf16>, vector<8x4xf32> -> vector<8x4xf32>
    %cst_20 = arith.constant dense<0xFF800000> : vector<8xf32>
    %43 = vector.multi_reduction <maximumf>, %42, %cst_20 [1] : vector<8x4xf32> to vector<8xf32>
    %44 = vector.shape_cast %43 : vector<8xf32> to vector<8x1xf32>
    %45 = vector.broadcast %44 : vector<8x1xf32> to vector<8x4xf32>
    %46 = arith.subf %42, %45 : vector<8x4xf32>
    %47 = math.exp %46 : vector<8x4xf32>
    %cst_21 = arith.constant dense<0.000000e+00> : vector<8xf32>
    %48 = vector.multi_reduction <add>, %47, %cst_21 [1] : vector<8x4xf32> to vector<8xf32>
    %49 = vector.shape_cast %48 : vector<8xf32> to vector<8x1xf32>
    %50 = tpu.reciprocal %49 {approx = true} : vector<8x1xf32> -> vector<8x1xf32>
    %51 = vector.broadcast %50 : vector<8x1xf32> to vector<8x4xf32>
    %52 = arith.mulf %47, %51 : vector<8x4xf32>
    %53 = arith.truncf %52 : vector<8x4xf32> to vector<8x4xbf16>
    %54 = arith.truncf %39 : vector<4x128xf32> to vector<4x128xbf16>
    %cst_22 = arith.constant dense<0.000000e+00> : vector<8x128xf32>
    %55 = tpu.matmul %53, %54, %cst_22 {dimension_numbers = #tpu.dot_dimension_numbers<[1], [0], [0], [1], [0, 0, 1, 1], [], []>} : vector<8x4xbf16>, vector<4x128xbf16>, vector<8x128xf32> -> vector<8x128xf32>
    %56 = arith.truncf %55 : vector<8x128xf32> to vector<8x128xbf16>
    %c0_23 = arith.constant 0 : index
    %c0_24 = arith.constant 0 : index
    %57 = vector.load %arg8[%c0_23, %c0_24] : memref<128x128xbf16, #tpu.memory_space<vmem>>, vector<128x128xbf16>
    %cst_25 = arith.constant dense<0.000000e+00> : vector<8x128xf32>
    %58 = tpu.matmul %56, %57, %cst_25 {dimension_numbers = #tpu.dot_dimension_numbers<[1], [0], [0], [1], [0, 0, 1, 1], [], []>} : vector<8x128xbf16>, vector<128x128xbf16>, vector<8x128xf32> -> vector<8x128xf32>
    %c0_26 = arith.constant 0 : index
    %c0_27 = arith.constant 0 : index
    %59 = vector.load %arg9[%c0_26, %c0_27] : memref<1x128xf32, #tpu.memory_space<vmem>>, vector<1x128xf32>
    %60 = vector.broadcast %59 : vector<1x128xf32> to vector<8x128xf32>
    %61 = arith.addf %58, %60 : vector<8x128xf32>
    %62 = arith.addf %31, %61 : vector<8x128xf32>
    %cst_28 = arith.constant dense<0.000000e+00> : vector<8xf32>
    %63 = vector.multi_reduction <add>, %62, %cst_28 [1] : vector<8x128xf32> to vector<8xf32>
    %64 = vector.shape_cast %63 : vector<8xf32> to vector<8x1xf32>
    %cst_29 = arith.constant 1.562500e-02 : f32
    %65 = vector.broadcast %cst_29 : f32 to vector<8x1xf32>
    %66 = arith.mulf %64, %65 : vector<8x1xf32>
    %67 = vector.broadcast %66 : vector<8x1xf32> to vector<8x128xf32>
    %68 = arith.subf %62, %67 : vector<8x128xf32>
    %69 = tpu.iota {dimensions = array<i32: 1>} : vector<8x128xi32>
    %c64_i32 = arith.constant 64 : i32
    %70 = vector.broadcast %c64_i32 : i32 to vector<8x128xi32>
    %71 = arith.cmpi slt, %69, %70 : vector<8x128xi32>
    %cst_30 = arith.constant 0.000000e+00 : f32
    %72 = vector.broadcast %cst_30 : f32 to vector<8x128xf32>
    %73 = arith.select %71, %68, %72 : vector<8x128xi1>, vector<8x128xf32>
    %74 = arith.mulf %73, %73 : vector<8x128xf32>
    %cst_31 = arith.constant dense<0.000000e+00> : vector<8xf32>
    %75 = vector.multi_reduction <add>, %74, %cst_31 [1] : vector<8x128xf32> to vector<8xf32>
    %76 = vector.shape_cast %75 : vector<8xf32> to vector<8x1xf32>
    %cst_32 = arith.constant 1.562500e-02 : f32
    %77 = vector.broadcast %cst_32 : f32 to vector<8x1xf32>
    %78 = arith.mulf %76, %77 : vector<8x1xf32>
    %cst_33 = arith.constant 9.99999974E-6 : f32
    %79 = vector.broadcast %cst_33 : f32 to vector<8x1xf32>
    %80 = arith.addf %78, %79 : vector<8x1xf32>
    %81 = math.rsqrt %80 : vector<8x1xf32>
    %82 = vector.broadcast %81 : vector<8x1xf32> to vector<8x128xf32>
    %83 = arith.mulf %73, %82 : vector<8x128xf32>
    %c0_34 = arith.constant 0 : index
    %c0_35 = arith.constant 0 : index
    %84 = vector.load %arg10[%c0_34, %c0_35] : memref<1x128xf32, #tpu.memory_space<vmem>>, vector<1x128xf32>
    %85 = vector.broadcast %84 : vector<1x128xf32> to vector<8x128xf32>
    %86 = arith.mulf %83, %85 : vector<8x128xf32>
    %c0_36 = arith.constant 0 : index
    %c0_37 = arith.constant 0 : index
    %87 = vector.load %arg11[%c0_36, %c0_37] : memref<1x128xf32, #tpu.memory_space<vmem>>, vector<1x128xf32>
    %88 = vector.broadcast %87 : vector<1x128xf32> to vector<8x128xf32>
    %89 = arith.addf %86, %88 : vector<8x128xf32>
    %90 = arith.truncf %89 : vector<8x128xf32> to vector<8x128xbf16>
    %c0_38 = arith.constant 0 : index
    %c0_39 = arith.constant 0 : index
    %91 = vector.load %arg12[%c0_38, %c0_39] : memref<128x128xbf16, #tpu.memory_space<vmem>>, vector<128x128xbf16>
    %cst_40 = arith.constant dense<0.000000e+00> : vector<8x128xf32>
    %92 = tpu.matmul %90, %91, %cst_40 {dimension_numbers = #tpu.dot_dimension_numbers<[1], [0], [0], [1], [0, 0, 1, 1], [], []>} : vector<8x128xbf16>, vector<128x128xbf16>, vector<8x128xf32> -> vector<8x128xf32>
    %c0_41 = arith.constant 0 : index
    %c0_42 = arith.constant 0 : index
    %93 = vector.load %arg13[%c0_41, %c0_42] : memref<1x128xf32, #tpu.memory_space<vmem>>, vector<1x128xf32>
    %94 = vector.broadcast %93 : vector<1x128xf32> to vector<8x128xf32>
    %95 = arith.addf %92, %94 : vector<8x128xf32>
    %96 = arith.mulf %95, %95 : vector<8x128xf32>
    %97 = arith.mulf %95, %96 : vector<8x128xf32>
    %cst_43 = arith.constant 4.471500e-02 : f32
    %98 = vector.broadcast %cst_43 : f32 to vector<8x128xf32>
    %99 = arith.mulf %98, %97 : vector<8x128xf32>
    %100 = arith.addf %95, %99 : vector<8x128xf32>
    %cst_44 = arith.constant 0.797884583 : f32
    %101 = vector.broadcast %cst_44 : f32 to vector<8x128xf32>
    %102 = arith.mulf %101, %100 : vector<8x128xf32>
    %103 = math.tanh %102 : vector<8x128xf32>
    %cst_45 = arith.constant 1.000000e+00 : f32
    %104 = vector.broadcast %cst_45 : f32 to vector<8x128xf32>
    %105 = arith.addf %104, %103 : vector<8x128xf32>
    %cst_46 = arith.constant 5.000000e-01 : f32
    %106 = vector.broadcast %cst_46 : f32 to vector<8x128xf32>
    %107 = arith.mulf %106, %105 : vector<8x128xf32>
    %108 = arith.mulf %95, %107 : vector<8x128xf32>
    %109 = arith.truncf %108 : vector<8x128xf32> to vector<8x128xbf16>
    %c0_47 = arith.constant 0 : index
    %c0_48 = arith.constant 0 : index
    %110 = vector.load %arg14[%c0_47, %c0_48] : memref<128x128xbf16, #tpu.memory_space<vmem>>, vector<128x128xbf16>
    %cst_49 = arith.constant dense<0.000000e+00> : vector<8x128xf32>
    %111 = tpu.matmul %109, %110, %cst_49 {dimension_numbers = #tpu.dot_dimension_numbers<[1], [0], [0], [1], [0, 0, 1, 1], [], []>} : vector<8x128xbf16>, vector<128x128xbf16>, vector<8x128xf32> -> vector<8x128xf32>
    %c0_50 = arith.constant 0 : index
    %c0_51 = arith.constant 0 : index
    %112 = vector.load %arg15[%c0_50, %c0_51] : memref<1x128xf32, #tpu.memory_space<vmem>>, vector<1x128xf32>
    %113 = vector.broadcast %112 : vector<1x128xf32> to vector<8x128xf32>
    %114 = arith.addf %111, %113 : vector<8x128xf32>
    %115 = arith.addf %62, %114 : vector<8x128xf32>
    %116 = vector.extract_strided_slice %115 {offsets = [0, 0], sizes = [8, 64], strides = [1, 1]} : vector<8x128xf32> to vector<8x64xf32>
    %c0_52 = arith.constant 0 : index
    %c0_53 = arith.constant 0 : index
    %117 = vector.load %arg16[%c0_52, %c0_53] : memref<8x64xf32, #tpu.memory_space<vmem>>, vector<8x64xf32>
    tpu.vector_store %arg16[%c0_52, %c0_53], %116 {strides = array<i32>} : memref<8x64xf32, #tpu.memory_space<vmem>>, vector<8x64xf32>,
    return
  }
  func.func @transform_0(%arg0: i32) -> (i32, i32) {
    %c0_i32 = arith.constant 0 : i32
    %c0_i32_0 = arith.constant 0 : i32
    return %arg0, %c0_i32 : i32, i32
  }
  func.func @transform_1(%arg0: i32) -> (i32, i32) {
    %c0_i32 = arith.constant 0 : i32
    %c0_i32_0 = arith.constant 0 : i32
    %c0_i32_1 = arith.constant 0 : i32
    return %c0_i32, %c0_i32_0 : i32, i32
  }
  func.func @transform_2(%arg0: i32) -> (i32, i32) {
    %c0_i32 = arith.constant 0 : i32
    %c0_i32_0 = arith.constant 0 : i32
    %c0_i32_1 = arith.constant 0 : i32
    return %c0_i32, %c0_i32_0 : i32, i32
  }
  func.func @transform_3(%arg0: i32) -> (i32, i32) {
    %c0_i32 = arith.constant 0 : i32
    %c0_i32_0 = arith.constant 0 : i32
    %c0_i32_1 = arith.constant 0 : i32
    return %c0_i32, %c0_i32_0 : i32, i32
  }
  func.func @transform_4(%arg0: i32) -> (i32, i32) {
    %c0_i32 = arith.constant 0 : i32
    %c0_i32_0 = arith.constant 0 : i32
    %c0_i32_1 = arith.constant 0 : i32
    return %c0_i32, %c0_i32_0 : i32, i32
  }
  func.func @transform_5(%arg0: i32) -> (i32, i32) {
    %c0_i32 = arith.constant 0 : i32
    %c0_i32_0 = arith.constant 0 : i32
    %c0_i32_1 = arith.constant 0 : i32
    return %c0_i32, %c0_i32_0 : i32, i32
  }
  func.func @transform_6(%arg0: i32) -> (i32, i32) {
    %c0_i32 = arith.constant 0 : i32
    %c0_i32_0 = arith.constant 0 : i32
    %c0_i32_1 = arith.constant 0 : i32
    return %c0_i32, %c0_i32_0 : i32, i32
  }
  func.func @transform_7(%arg0: i32) -> (i32, i32) {
    %c0_i32 = arith.constant 0 : i32
    %c0_i32_0 = arith.constant 0 : i32
    %c0_i32_1 = arith.constant 0 : i32
    return %c0_i32, %c0_i32_0 : i32, i32
  }
  func.func @transform_8(%arg0: i32) -> (i32, i32) {
    %c0_i32 = arith.constant 0 : i32
    %c0_i32_0 = arith.constant 0 : i32
    %c0_i32_1 = arith.constant 0 : i32
    return %c0_i32, %c0_i32_0 : i32, i32
  }
  func.func @transform_9(%arg0: i32) -> (i32, i32) {
    %c0_i32 = arith.constant 0 : i32
    %c0_i32_0 = arith.constant 0 : i32
    %c0_i32_1 = arith.constant 0 : i32
    return %c0_i32, %c0_i32_0 : i32, i32
  }
  func.func @transform_10(%arg0: i32) -> (i32, i32) {
    %c0_i32 = arith.constant 0 : i32
    %c0_i32_0 = arith.constant 0 : i32
    %c0_i32_1 = arith.constant 0 : i32
    return %c0_i32, %c0_i32_0 : i32, i32
  }
  func.func @transform_11(%arg0: i32) -> (i32, i32) {
    %c0_i32 = arith.constant 0 : i32
    %c0_i32_0 = arith.constant 0 : i32
    %c0_i32_1 = arith.constant 0 : i32
    return %c0_i32, %c0_i32_0 : i32, i32
  }
  func.func @transform_12(%arg0: i32) -> (i32, i32) {
    %c0_i32 = arith.constant 0 : i32
    %c0_i32_0 = arith.constant 0 : i32
    %c0_i32_1 = arith.constant 0 : i32
    return %c0_i32, %c0_i32_0 : i32, i32
  }
  func.func @transform_13(%arg0: i32) -> (i32, i32) {
    %c0_i32 = arith.constant 0 : i32
    %c0_i32_0 = arith.constant 0 : i32
    %c0_i32_1 = arith.constant 0 : i32
    return %c0_i32, %c0_i32_0 : i32, i32
  }
  func.func @transform_14(%arg0: i32) -> (i32, i32) {
    %c0_i32 = arith.constant 0 : i32
    %c0_i32_0 = arith.constant 0 : i32
    %c0_i32_1 = arith.constant 0 : i32
    return %c0_i32, %c0_i32_0 : i32, i32
  }
  func.func @transform_15(%arg0: i32) -> (i32, i32) {
    %c0_i32 = arith.constant 0 : i32
    %c0_i32_0 = arith.constant 0 : i32
    return %arg0, %c0_i32 : i32, i32
  }
}

</mosaic_0001>

<bundles_post_ra>
// kernel: tpu_custom_call.1
= control target key start
LH: loop header
LB: loop body
LE: loop exit
PB: predicated region body
PF: predicated region fallthrough
CT: control target
= control target key end

     0   :  { %s2413_s0 = inlined_call_operand.hbm [shape: f32[16,32], index: 0, kind: input, shape index: {}]   ;;  %s2414_s1 = inlined_call_operand.vmem [shape: f32[1,32], index: 1, kind: input, shape index: {}]   ;;  %s2415_s2 = inlined_call_operand.vmem [shape: f32[1,32], index: 2, kind: input, shape index: {}]   ;;  %s2416_s3 = inlined_call_operand.hbm [shape: bf16[32,384], index: 3, kind: input, shape index: {}]   ;;  %s2417_s4 = inlined_call_operand.vmem [shape: f32[1,384], index: 4, kind: input, shape index: {}]   ;;  %s2418_s5 = inlined_call_operand.vmem [shape: bf16[4,8], index: 5, kind: input, shape index: {}]   ;;  %s2419_s6 = inlined_call_operand.vmem [shape: f32[4,1], index: 6, kind: input, shape index: {}]   ;;  %s2420_s7 = inlined_call_operand.hbm [shape: bf16[128,128], index: 7, kind: input, shape index: {}]   ;;  %s2421_s8 = inlined_call_operand.vmem [shape: f32[1,128], index: 8, kind: input, shape index: {}]   ;;  %s2422_s9 = inlined_call_operand.vmem [shape: f32[1,128], index: 9, kind: input, shape index: {}]   ;;  %s2423_s10 = inlined_call_operand.vmem [shape: f32[1,128], index: 10, kind: input, shape index: {}]   ;;  %s2424_s11 = inlined_call_operand.hbm [shape: bf16[128,128], index: 11, kind: input, shape index: {}]   ;;  %s2425_s12 = inlined_call_operand.vmem [shape: f32[1,128], index: 12, kind: input, shape index: {}]   ;;  %s2426_s13 = inlined_call_operand.hbm [shape: bf16[128,128], index: 13, kind: input, shape index: {}]   ;;  %s2427_s14 = inlined_call_operand.vmem [shape: f32[1,128], index: 14, kind: input, shape index: {}]   ;;  %s2428_s15 = inlined_call_operand.hbm [shape: f32[16,64], index: 15, kind: output, shape index: {}]  }
   0x1   :  { %2433 = sst [smem:[#allocation16_spill]] %s2416_s3 }
   0x2   :  { %2434 = sst [smem:[#allocation17_spill]] %s2418_s5 }
   0x3   :  { %2435 = sst [smem:[#allocation18_spill]] %s2421_s8 }
   0x4   :  { %2436 = sst [smem:[#allocation19_spill]] %s2422_s9 }
   0x5   :  { %2437 = sst [smem:[#allocation20_spill]] %s2423_s10 }
   0x6   :  { %2438 = sst [smem:[#allocation21_spill]] %s2425_s12 }
   0x7   :  { %2439 = sst [smem:[#allocation22_spill]] %s2427_s14 }
   0x8   :  { %2440 = sst [smem:[#allocation23_spill]] %s2428_s15 }
   0x9   :  { %20 = vsyncpa [#allocation3], 0 }
   0xa   :  { %22 = vsyncpa [#allocation3 + $0x1], 0 }
   0xb   :  { %23 = vsyncpa [#allocation6], 0 }
   0xc   :  { %24 = vsyncpa [#allocation9], 0 }
   0xd   :  { %25 = vsyncpa [#allocation4], 0 }
   0xe   :  { %27 = vsyncpa [#allocation4 + $0x1], 0  ;;  %s2035_s18 = smov 0   ;;  %s2037_s19 = smov 0  }
   0xf   :  { %s2039_s20 = smov 0   ;;  %s2041_s21 = smov 0  }
  0x10 LB: > { %s1942_s22 = smov [#allocation5]   ;;  %s2056_s24 = sadd.s32 4294967295, %s1940_s21   ;;  %s1940_s21 = sphi %s2041_s21, %s2469_s21   ;;  %s1936_s20 = sphi %s2039_s20, %s2468_s20   ;;  %s1932_s19 = sphi %s2037_s19, %s2467_s19   ;;  %s1928_s18 = sphi %s2035_s18, %s2466_s18  }
  0x11   : > { %s402_s23 = sshll.u32 %s1942_s22, 4  ;;  %p1411_p0 = scmp.ge.s32.totalorder %s1940_s21, 1  ;;  %s2061_s23 = int_to_ptr.vmem [resolvable:$true] %s402_s23 }
  0x12   : > { %p2430_p1 = scmp.eq.s32.totalorder %s2056_s24, 0  ;;  %p384_p2 = scmp.lt.s32.totalorder %s1940_s21, 3 }
  0x13   : > { %s1943_s27 = smov [#allocation8]   ;;  %s1944_s29 = smov [#allocation7]  }
  0x14   : > { %p2063_p3 = pnand %p1411_p0, %p384_p2  ;;  %s446_s28 = sshll.u32 %s1943_s27, 4  ;;  %s2076_s28 = int_to_ptr.vmem [resolvable:$true] %s446_s28 }
  0x15   : > { %s2078_s30 = sshll.u32 %s1944_s29, 4  ;;  %s2443_s3 = sld [smem:[#allocation16_spill]]  ;;  %s425_s30 = int_to_ptr.vmem [resolvable:$true] %s2078_s30 }
  0x16   : > { %s2441_s25 = scalar_select %p2063_p3, 1, 0 }
  0x17   : > { %p1606_p5 = pneg %p2063_p3 }
  0x19   : > { %p2072_p6 = pnand %p1606_p5, %p2430_p1 }
  0x1b   : > { %s1724_s22 = scalar_lea.hbm %s2443_s3, 768  ;;  %p2088_p8 = pneg %p2072_p6 }
  0x1c   : > { %p1725_p7 = scmp.ne.s32.totalorder %s2443_s3, %s1724_s22  ;;  %p1731_p11 = scmp.lt.u32.totalorder %s1724_s22, %s2443_s3 }
  0x1e   : > { %p1727_p9 = pnand %p2088_p8, %p1725_p7 }
  0x20   : > { %p1728_p10 = pneg %p1727_p9 }
  0x22   : > { %p1733_p12 = pnand %p1731_p11, %p1728_p10 }
  0x24   : > { %1736 = shalt.err (!%p1733_p12)
}
  0x25   : > { %s1737_s14 = scalar_lea.vmem %s2061_s23, 768  ;;  %p1745_p5 = scmp.lt.s32.totalorder %s2061_s23, %s2061_s23 }
  0x26   : > { %p1738_p13 = scmp.ne.s32.totalorder %s2061_s23, %s1737_s14  ;;  %p1746_p4 = scmp.lt.s32.totalorder %s1737_s14, %s1737_s14 }
  0x28   : > { %p1740_p0 = pnand %p1738_p13, %p2088_p8  ;;  %p1747_p7 = por %p1746_p4, %p1745_p5 }
  0x2a   : > { %p1741_p2 = pneg %p1740_p0 }
  0x2c   : > { %p1748_p9 = pnand %p1747_p7, %p1741_p2 }
  0x2e   : > { %1751 = shalt.err (!%p1748_p9)
}
  0x2f   : > { %s1945_s15 = smov 192   ;;  %s1946_s16 = smov 12  }
  0x30   : > { %1609 = dma.hbm_to_vmem [thread:$0]  (!%p2072_p6), %s2443_s3, 768, %s2061_s23, [#allocation6], %s1945_s15, %s1945_s15, %s1946_s16  }
  0x31   : > { %s1752_s10 = scalar_lea.hbm %s2424_s11, 1024 }
  0x32   : > { %p1753_p4 = scmp.ne.s32.totalorder %s2424_s11, %s1752_s10  ;;  %p1759_p12 = scmp.lt.u32.totalorder %s1752_s10, %s2424_s11 }
  0x34   : > { %p1755_p10 = pnand %p1753_p4, %p2088_p8 }
  0x36   : > { %p1756_p11 = pneg %p1755_p10 }
  0x38   : > { %p1761_p13 = pnand %p1759_p12, %p1756_p11 }
  0x3a   : > { %1764 = shalt.err (!%p1761_p13)
}
  0x3b   : > { %s1765_s23 = scalar_lea.vmem %s2076_s28, 1024  ;;  %p1773_p7 = scmp.lt.s32.totalorder %s2076_s28, %s2076_s28 }
  0x3c   : > { %p1766_p0 = scmp.ne.s32.totalorder %s2076_s28, %s1765_s23  ;;  %p1774_p9 = scmp.lt.s32.totalorder %s1765_s23, %s1765_s23 }
  0x3e   : > { %p1768_p2 = pnand %p1766_p0, %p2088_p8  ;;  %p1775_p4 = por %p1774_p9, %p1773_p7 }
  0x40   : > { %p1769_p5 = pneg %p1768_p2 }
  0x42   : > { %p1776_p10 = pnand %p1775_p4, %p1769_p5 }
  0x44   : > { %1779 = shalt.err (!%p1776_p10)
}
  0x45   : > { %s1947_s8 = smov 64   ;;  %s1948_s5 = smov 4  }
  0x46   : > { %1615 = dma.hbm_to_vmem [thread:$0]  (!%p2072_p6), %s2424_s11, 1024, %s2076_s28, [#allocation9], %s1947_s8, %s1947_s8, %s1948_s5  }
  0x47   : > { %s1780_s17 = scalar_lea.hbm %s2420_s7, 1024 }
  0x48   : > { %p1781_p11 = scmp.ne.s32.totalorder %s2420_s7, %s1780_s17  ;;  %p1787_p0 = scmp.lt.u32.totalorder %s1780_s17, %s2420_s7 }
  0x4a   : > { %p1783_p12 = pnand %p1781_p11, %p2088_p8 }
  0x4c   : > { %p1784_p13 = pneg %p1783_p12 }
  0x4e   : > { %p1789_p2 = pnand %p1787_p0, %p1784_p13 }
  0x50   : > { %1792 = shalt.err (!%p1789_p2)
}
  0x51   : > { %s1793_s23 = scalar_lea.vmem %s425_s30, 1024  ;;  %p1801_p4 = scmp.lt.s32.totalorder %s425_s30, %s425_s30 }
  0x52   : > { %p1794_p5 = scmp.ne.s32.totalorder %s425_s30, %s1793_s23  ;;  %p1802_p10 = scmp.lt.s32.totalorder %s1793_s23, %s1793_s23 }
  0x54   : > { %p1796_p7 = pnand %p1794_p5, %p2088_p8  ;;  %p1803_p1 = por %p1802_p10, %p1801_p4 }
  0x56   : > { %p1797_p9 = pneg %p1796_p7 }
  0x58   : > { %p1804_p3 = pnand %p1803_p1, %p1797_p9 }
  0x5a   : > { %1807 = shalt.err (!%p1804_p3)
}
  0x5b   : > { %1612 = dma.hbm_to_vmem [thread:$0]  (!%p2072_p6), %s2420_s7, 1024, %s425_s30, [#allocation6], %s1947_s8, %s1947_s8, %s1948_s5  }
  0x5c   : > { %s1949_s10 = smov [#allocation10]   ;;  %s1808_s22 = scalar_lea.hbm %s2426_s13, 1024 }
  0x5d   : > { %s462_s15 = sshll.u32 %s1949_s10, 4  ;;  %p1809_p1 = scmp.ne.s32.totalorder %s2426_s13, %s1808_s22  ;;  %s463_s15 = int_to_ptr.vmem [resolvable:$true] %s462_s15 }
  0x5e   : > { %p1815_p12 = scmp.lt.u32.totalorder %s1808_s22, %s2426_s13 }
  0x5f   : > { %p1811_p3 = pnand %p1809_p1, %p2088_p8 }
  0x61   : > { %p1812_p11 = pneg %p1811_p3 }
  0x63   : > { %p1817_p13 = pnand %p1815_p12, %p1812_p11 }
  0x65   : > { %1820 = shalt.err (!%p1817_p13)
}
  0x66   : > { %s1821_s30 = scalar_lea.vmem %s463_s15, 1024  ;;  %p1829_p7 = scmp.lt.s32.totalorder %s463_s15, %s463_s15 }
  0x67   : > { %p1822_p0 = scmp.ne.s32.totalorder %s463_s15, %s1821_s30  ;;  %p1830_p9 = scmp.lt.s32.totalorder %s1821_s30, %s1821_s30 }
  0x69   : > { %p1824_p2 = pnand %p1822_p0, %p2088_p8  ;;  %p1831_p4 = por %p1830_p9, %p1829_p7 }
  0x6b   : > { %p1825_p5 = pneg %p1824_p2 }
  0x6d   : > { %p1832_p10 = pnand %p1831_p4, %p1825_p5 }
  0x6f   : > { %1835 = shalt.err (!%p1832_p10)
}
  0x70   : > { %1618 = dma.hbm_to_vmem [thread:$0]  (!%p2072_p6), %s2426_s13, 1024, %s463_s15, [#allocation9], %s1947_s8, %s1947_s8, %s1948_s5  }
  0x71   : > { %s1410_s12 = sadd.s32 4294967294, %s1940_s21   ;;  %s2180_s26 = sadd.s32 1, %s1940_s21  }
  0x72   : > { %s37_s10 = ssub.s32 %s1940_s21, %s2180_s26  ;;  %s40_s16 = sadd.s32 1, %s1936_s20 }
  0x73   : > { %p38_p8 = scmp.eq.s32.totalorder %s37_s10, 0  ;;  %p47_p1 = scmp.ne.s32.totalorder %s1936_s20, %s1932_s19 }
  0x74   : > { %p48_p3 = scmp.eq.s32.totalorder %s1940_s21, 0  ;;  %p53_p11 = scmp.ne.s32.totalorder %s1932_s19, %s1928_s18 }
  0x75   : > { %s2191_s17 = scalar_select %p38_p8, %s1936_s20, %s40_s16  }
  0x76   : > { %p2193_p12 = por %p48_p3, %p47_p1  ;;  %p2446_p13 = scmp.eq.s32.totalorder %s2056_s24, 0 }
  0x77   : > { %p371_p0 = scmp.eq.s32.totalorder %s2056_s24, 1  ;;  %p377_p2 = scmp.eq.s32.totalorder %s1410_s12, 1 }
  0x78   : > { %p2199_p6 = por %p2446_p13, %p53_p11  ;;  %p1631_p5 = scmp.lt.s32.totalorder %s1940_s21, 2 }
  0x79   : > { %s479_s5 = sand.u32 1, %s1936_s20   ;;  %p2206_p7 = por %p371_p0, %p47_p1 }
  0x7a   : > { %p2210_p9 = por %p377_p2, %p53_p11  ;;  %s1417_s29 = sshll.u32 %s479_s5, 3 }
  0x7b   : > { %s2448_s15 = scalar_select %p2206_p7, 1, 0 }
  0x7c   : > { %s2449_s27 = scalar_select %p2210_p9, 1, 0 }
  0x7d   : > { %s1418_s14 = sshll.u32 %s1940_s21, 7  ;;  %s483_s9 = scalar_lea.vmem [#allocation2], %s1417_s29 }
  0x7e   : > { %s2218_s28 = scalar_lea.hbm %s2413_s0, %s1418_s14  ;;  %s490_s12 = sshll.u32 %s483_s9, 4  ;;  %s2220_s12 = int_to_ptr.vmem [resolvable:$true] %s490_s12 }
  0x7f   : > { %p2224_p4 = pnand %p1631_p5, %p2193_p12  ;;  %s480_s16 = scalar_lea.sflag [#allocation3], %s479_s5 }
  0x80   : > { %s1836_s3 = scalar_lea.hbm %s2218_s28, 128  ;;  %s1841_s23 = scalar_lea.hbm %s2413_s0, 256 }
  0x81   : > { %p1837_p10 = scmp.ne.s32.totalorder %s2218_s28, %s1836_s3  ;;  %p1838_p8 = pneg %p2224_p4 }
  0x82   : > { %p1842_p11 = scmp.lt.u32.totalorder %s2218_s28, %s2413_s0  ;;  %p1843_p12 = scmp.lt.u32.totalorder %s1841_s23, %s1836_s3 }
  0x83   : > { %p1839_p1 = pnand %p1838_p8, %p1837_p10  ;;  %p1845_p0 = scmp.lt.u32.totalorder %s1836_s3, %s2218_s28 }
  0x84   : > { %p1844_p13 = por %p1843_p12, %p1842_p11 }
  0x85   : > { %p1840_p3 = pneg %p1839_p1 }
  0x86   : > { %p1846_p2 = por %p1845_p0, %p1844_p13 }
  0x88   : > { %p1847_p5 = pnand %p1846_p2, %p1840_p3 }
  0x8a   : > { %1850 = shalt.err (!%p1847_p5)
}
  0x8b   : > { %s1851_s5 = scalar_lea.vmem %s2220_s12, 128  ;;  %s1950_s9 = smov [#allocation2]  }
  0x8c   : > { %p1852_p10 = scmp.ne.s32.totalorder %s2220_s12, %s1851_s5  ;;  %s1856_s29 = sshll.u32 %s1950_s9, 4  ;;  %s1857_s29 = int_to_ptr.vmem [resolvable:$false] %s1856_s29 }
  0x8d   : > { %s1858_s14 = scalar_lea.vmem %s1857_s29, 256  ;;  %p1859_p7 = scmp.lt.s32.totalorder %s2220_s12, %s1857_s29 }
  0x8e   : > { %p1854_p1 = pnand %p1852_p10, %p1838_p8  ;;  %p1860_p11 = scmp.lt.s32.totalorder %s1858_s14, %s1851_s5 }
  0x90   : > { %p1855_p9 = pneg %p1854_p1  ;;  %p1861_p12 = por %p1860_p11, %p1859_p7 }
  0x92   : > { %p1862_p13 = pnand %p1861_p12, %p1855_p9 }
  0x94   : > { %1865 = shalt.err (!%p1862_p13)
}
  0x95   : > { %1622 = dma.hbm_to_vmem [thread:$0]  (!%p2224_p4), %s2218_s28, 128, %s2220_s12, %s480_s16  }
  0x96   : > { %p2451_p3 = scmp.ne.s32.totalorder %s2441_s25, 0 }
  0x97   : > { %s2256_s3 = sand.u32 (!%p2451_p3), 1, %s1932_s19  }
  0x98   : > { %499 = sbr.rel (%p2451_p3) target bundleno = 2678 (0xa76), region = 80  ;;  %s1420_s23 = sshll.u32 (!%p2451_p3), %s2256_s3, 3 }
  0x99   : > { %s502_s22 = scalar_lea.sflag (!%p2451_p3), [#allocation3], %s2256_s3  ;;  %s505_s30 = scalar_lea.vmem (!%p2451_p3), [#allocation2], %s1420_s23 }
  0x9f   : > { %1911 = dma.done.wait (%p2199_p6), %s502_s22, 128  }
  0xa0   : > { %1913 = vsyncadd (%p2199_p6), %s502_s22, 4294967168  ;;  %p2452_p7 = scmp.eq.s32.totalorder %s2056_s24, 0 }
  0xa2   : > { %1915 = dma.done.wait (%p2452_p7), [#allocation6], 1792   ;;  %p2453_p9 = pmov %p2452_p7 }
  0xa3   : > { %p2454_p4 = pmov %p2452_p7 }
  0xa4   : > { %1917 = vsyncadd (%p2453_p9), [#allocation6], 4294965504 }
  0xa5   : > { %1919 = dma.done.wait (%p2454_p4), [#allocation9], 2048   ;;  %p2455_p8 = pmov %p2454_p4 }
  0xa6   : > { %vm570_vm0 = vcmask 261120   ;;  %v569_v0 = vld [vmem:[%s505_s30] sm:$0xff]  ;;  %v1684_v8 = vld [vmem:[#allocation5] ss:$12 sps:$4 sm:$0xff]   ;;  %v1951_v10 = vmov 0   ;;  %v1952_v12 = vmov 0.0   ;;  %v611_v26 = vlaneseq }
  0xa7   : > { %1921 = vsyncadd (%p2455_p8), [#allocation9], 4294965248  ;;  %v571_v1 = vsel %vm570_vm0, %v569_v0, 0.0  ;;  %v1682_v7 = vld [vmem:[#allocation5 + $0x4] ss:$12 sps:$4 sm:$0xff]   ;;  %693 = vmatprep.mubr.bf16.mxu0 %v1951_v10  ;;  %1680 = vset.pattern.permute.xlu1 %v1951_v10  ;;  %vm1953_vm1 = vmmov 0  }
  0xa8   : > { %572 = vadd.xlane.f32.xlu0 %v571_v1  ;;  %v1685_v9 = vld [vmem:[#allocation5 + $0x1c] ss:$12 sps:$4 sm:$0xff]   ;;  %661 = vmatprep.subr.bf16.mxu0 %v1682_v7  ;;  %v1687_v11 = vld [vmem:[#allocation5 + $0x18] ss:$12 sps:$4 sm:$0xff]   ;;  %v1426_v17 = vld [vmem:[%s2414_s1] ss:$0 sm:$0xff] }
  0xa9   : > { %662 = vmatpush1.bf16.msra.mxu0 %v1684_v8  ;;  %1681 = vset.pattern.permute.xlu0 %v1951_v10  ;;  %v1427_v19 = vld [vmem:[%s2415_s2] ss:$0 sm:$0xff]  ;;  %v1688_v22 = vld [vmem:[#allocation5 + $0x8] ss:$12 sps:$4 sm:$0xff]   ;;  %v1689_v24 = vld [vmem:[#allocation5 + $0x20] ss:$12 sps:$4 sm:$0xff]  }
  0xaa   : > { %663 = vmatprep.subr.bf16.mxu0 %v1685_v9  ;;  %1514 = vmatprep.subr.bf16.mxu1 %v1952_v12  ;;  %v797_v25 = vld [vmem:[%s2419_s6] sm:$0xf]  ;;  %v612_v27 = vshrl.u32 %v611_v26, 7  ;;  %vm749_vm2 = vcmask 1043456   ;;  %s2456_s22 = sld [smem:[#allocation17_spill]]  ;;  %vm745_vm3 = vcmask 64512  }
  0xab   : > { %1516 = vmatprep.mubr.msk.bf16.mxu1 %vm1953_vm1, %v1952_v12  ;;  %800 = vperm.xlu1 %1680, %v797_v25   ;;  %v609_v29 = vld [vmem:[%s2417_s4] sm:$0x7]  ;;  %vm864_vm4 = vcmask 1041408   ;;  %vm847_vm5 = vcmask 31744   ;;  %v1691_v8 = vld [vmem:[#allocation7 + $0x8] sm:$0xff]   ;;  %v1692_v9 = vld [vmem:[#allocation7 + $0x10] sm:$0xff]  }
  0xac   : > { %v617_v28 = vsub.s32 1, %v612_v27  ;;  %v621_v33 = vsub.s32 2, %v612_v27  ;;  %v613_v47 = vsub.s32 0, %v612_v27  ;;  %v1690_v7 = vld [vmem:[#allocation7] sm:$0xff]   ;;  %s2457_s8 = sld [smem:[#allocation18_spill]]  ;;  %s2458_s10 = sld [smem:[#allocation19_spill]] }
  0xad   : > { %664 = vmatpush1.bf16.msra.mxu0 %v1687_v11  ;;  %v1694_v11 = vld [vmem:[#allocation7 + $0x20] sm:$0xff]   ;;  %s2459_s9 = sld [smem:[#allocation20_spill]]  ;;  %s1469_s28 = sshll.u32 %s2056_s24, 7  ;;  %vm1286_vm7 = vcmask 523264  }
  0xae   : > { %1506 = vmatprep.subr.bf16.mxu0 %v1952_v12  ;;  %v618_v31 = vrot.slane %v609_v29, %v617_v28  ;;  %v622_v37 = vrot.slane %v609_v29, %v621_v33  ;;  %v614_v52 = vrot.slane %v609_v29, %v613_v47  ;;  %v1698_v33 = vld [vmem:[#allocation8] sm:$0xff]   ;;  %s567_s12 = scalar_lea.vmem [#allocation11], %s1420_s23  ;;  %s1289_s24 = scalar_lea.sflag [#allocation4], %s2256_s3 }
  0xaf   : > { %p2463_p0 = scmp.ne.s32.totalorder %s2448_s15, 0  ;;  %s1954_s14 = smov [#allocation11]  }
  0xb0   : > { %v742_v46 = vld [vmem:[%s2456_s22] sm:$0x3]  ;;  %s2460_s22 = sld [smem:[#allocation21_spill]] }
  0xb2   : > { %v1439_v25 = vld [vmem:[%s2457_s8] ss:$0 sm:$0xff]  ;;  %s2461_s8 = sld [smem:[#allocation22_spill]] }
 0x12a   : > { %v801_v48 = vpop.permute.xlu1 %800 }
 0x135   : > { %v573_v2 = vpop.xlane.xlu0 %572 }
 0x136   : > { %v574_v3 = vmul.f32 0.03125, %v573_v2 }
 0x138   : > { %v575_v4 = vsub.f32 %v569_v0, %v574_v3 }
 0x13a   : > { %v576_v5 = vmul.f32 %v575_v4, %v575_v4 }
 0x13c   : > { %v577_v6 = vsel %vm570_vm0, %v576_v5, 0.0 }
 0x13d   : > { %578 = vadd.xlane.f32.xlu0 %v577_v6 }
 0x1ca   : > { %v579_v13 = vpop.xlane.xlu0 %578 }
 0x1cb   : > { %v580_v14 = vmul.f32 0.03125, %v579_v13  ;;  %v1695_v13 = vld [vmem:[#allocation7 + $0x28] sm:$0xff]  }
 0x1cd   : > { %v581_v15 = vadd.f32 1e-05, %v580_v14  ;;  %v1696_v14 = vld [vmem:[#allocation7 + $0x30] sm:$0xff]  }
 0x1cf   : > { %1714 = vrsqrt.f32 %v581_v15 }
 0x1d9   : > { %v1715_v16 = vpop.eup %1714 }
 0x1da   : > { %v583_v18 = vmul.f32 %v1715_v16, %v575_v4 }
 0x1dc   : > { %v591_v20 = vmul.f32 %v1426_v17, %v583_v18 }
 0x1de   : > { %v599_v21 = vadd.f32 %v1427_v19, %v591_v20  ;;  %v1697_v19 = vld [vmem:[#allocation7 + $0x38] sm:$0xff]  }
 0x1e0   : > { %v600_v23 = vpack.c.bf16 %v599_v21, %v599_v21 }
 0x1e2   : > { %1434 = vmatmul.mubr.msk.bf16.vlgmr.msra.gmra.mrb[0].mxu0 %vm570_vm0, %v600_v23 }
 0x1e3   : > { %1507 = vmatpush3.bf16.msra.mxu0 %v1688_v22  ;;  %1510 = vmatprep.mubr.msk.bf16.mxu0 %vm1953_vm1, %v1952_v12 }
 0x1e4   : > { %1508 = vmatprep.subr.bf16.mxu0 %v1952_v12 }
 0x1e7   : > { %1509 = vmatpush3.bf16.msra.mxu0 %v1689_v24 }
 0x1ea   : > { %1511 = vmatmul.mubr.msk.bf16.vlgmr.msra.gmra.mrb[4].mxu0 %vm570_vm0, %v600_v23 }
 0x1eb   : > { %788 = vmatprep.mubr.bf16.mxu0 %v1951_v10  ;;  %v1693_v10 = vld [vmem:[#allocation7 + $0x18] sm:$0xff]  }
 0x2b5   : > { %v695_v30 = vpop.f32.mrb[0].mxu0 }
 0x2b6   : > { %v697_v32 = vpop.f32.mrb[1].mxu0  ;;  %v696_v58 = vadd.f32 %v695_v30, %v614_v52  ;;  %v1449_v52 = vld [vmem:[%s2459_s9] ss:$0 sm:$0xff]  ;;  %s2462_s9 = sld [smem:[#allocation23_spill]] }
 0x2b7   : > { %v699_v34 = vpop.f32.mrb[2].mxu0  ;;  %v698_v36 = vadd.f32 %v697_v32, %v618_v31 }
 0x2b8   : > { %v700_v35 = vpop.f32.mrb[3].mxu0  ;;  %v805_v60 = vpack.c.bf16 %v696_v58, %v696_v58  ;;  %v1699_v34 = vld [vmem:[#allocation8 + $0x8] sm:$0xff]   ;;  %v1708_v58 = vld [vmem:[#allocation10 + $0x10] sm:$0xff]  }
 0x2b9   : > { %v743_v39 = vpack.c.bf16 %v698_v36, %v698_v36  ;;  %v1026_v35 = vand.u32 127, %v611_v26  ;;  %v1703_v26 = vld [vmem:[#allocation8 + $0x28] sm:$0xff]  }
 0x2bb   : > { %v751_v45 = vsel %vm749_vm2, %v743_v39, 0  ;;  %vm1027_vm6 = vcmp.lt.s32.totalorder %v1026_v35, 64 }
 0x2bc   : > { %s2369_s29 = scalar_lea.hbm %s2462_s9, %s1469_s28 }
 0x2bd   : > { %v736_v38 = vpop.f32.mrb[4].mxu0 }
 0x2be   : > { %v2298_v40 = vadd.f32 %v736_v38, %v622_v37  ;;  %v1512_v41 = vpop.f32.mrb[5].mxu0 }
 0x2bf   : > { %v739_v42 = vpop.f32.mrb[6].mxu0  ;;  %v1700_v41 = vld [vmem:[#allocation8 + $0x10] sm:$0xff]  }
 0x2c0   : > { %v744_v43 = vpack.c.bf16 %v2298_v40, %v2298_v40  ;;  %v1513_v44 = vpop.f32.mrb[7].mxu0  ;;  %v1701_v42 = vld [vmem:[#allocation8 + $0x18] sm:$0xff]  }
 0x2c1   : > { %v1704_v44 = vld [vmem:[#allocation8 + $0x30] sm:$0xff]  }
 0x2c2   : > { %1436 = vmatprep.subr.msk.bf16.mxu0 %vm749_vm2, %v744_v43  ;;  %v1702_v43 = vld [vmem:[#allocation8 + $0x20] sm:$0xff]  }
 0x2c3   : > { %757 = vmatpush1.bf16.msra.mxu0 %v751_v45  ;;  %v1705_v45 = vld [vmem:[#allocation8 + $0x38] sm:$0xff]  }
 0x2c4   : > { %1520 = vmatprep.subr.bf16.mxu0 %v1952_v12 }
 0x2c6   : > { %1437 = vmatmul.mubr.msk.bf16.vlgmr.msra.gmra.mrb[8].mxu0 %vm745_vm3, %v742_v46 }
 0x2c7   : > { %1522 = vmatprep.mubr.msk.bf16.mxu0 %vm1953_vm1, %v1952_v12 }
 0x399   : > { %v790_v49 = vpop.f32.mrb[8].mxu0 }
 0x39a   : > { %v803_v50 = vmul.f32 %v801_v48, %v790_v49  ;;  %v792_v51 = vpop.f32.mrb[9].mxu0 }
 0x39b   : > { %v804_v53 = vmul.f32 %v801_v48, %v792_v51  ;;  %v794_v54 = vpop.f32.mrb[10].mxu0 }
 0x39c   : > { %v806_v55 = vpack.c.bf16 %v803_v50, %v803_v50  ;;  %v795_v56 = vpop.f32.mrb[11].mxu0  ;;  %v1448_v50 = vld [vmem:[%s2458_s10] ss:$0 sm:$0xff]  ;;  %s1302_s10 = sshll.u32 %s567_s12, 4  ;;  %s2371_s10 = int_to_ptr.vmem [resolvable:$true] %s1302_s10 }
 0x39d   : > { %v860_v57 = vpack.c.bf16 %v804_v53, %v804_v53  ;;  %v1706_v56 = vld [vmem:[#allocation10] sm:$0xff]   ;;  %s1866_s23 = scalar_lea.vmem %s2371_s10, 128 }
 0x39e   : > { %1515 = vmatpush3.bf16.xpose.msra.mxu1 %v806_v55  ;;  %p1867_p6 = scmp.ne.s32.totalorder %s2371_s10, %s1866_s23 }
 0x39f   : > { %v866_v59 = vsel %vm864_vm4, %v860_v57, 0  ;;  %1526 = vmatprep.subr.bf16.mxu1 %v1952_v12  ;;  %v1707_v57 = vld [vmem:[#allocation10 + $0x8] sm:$0xff]  }
 0x3a0   : > { %1521 = vmatpush3.bf16.msra.mxu0 %v866_v59  ;;  %v1709_v59 = vld [vmem:[#allocation10 + $0x18] sm:$0xff]   ;;  %p1868_p2 = pnand %p1867_p6, %p2463_p0 }
 0x3a1   : > { %1546 = vmatprep.subr.bf16.mxu0 %v1952_v12 }
 0x3a2   : > { %p1869_p5 = pneg %p1868_p2 }
 0x3a5   : > { %1517 = vmatmul.mubr.bf16.vlgmr.msra.gmra.mrb[0].mxu1 %v805_v60  ;;  %v1710_v60 = vld [vmem:[#allocation10 + $0x20] sm:$0xff]  }
 0x3a6   : > { %1542 = vmatprep.mubr.msk.bf16.mxu1 %vm1953_vm1, %v1952_v12  ;;  %1527 = vmatpush3.bf16.msra.mxu1 %v1690_v7 }
 0x3a7   : > { %1528 = vmatprep.subr.bf16.mxu1 %v1952_v12 }
 0x3aa   : > { %1529 = vmatpush3.bf16.msra.mxu1 %v1691_v8 }
 0x3ab   : > { %1530 = vmatprep.subr.bf16.mxu1 %v1952_v12 }
 0x3ae   : > { %1531 = vmatpush3.bf16.msra.mxu1 %v1692_v9 }
 0x3af   : > { %1532 = vmatprep.subr.bf16.mxu1 %v1952_v12 }
 0x3b2   : > { %1533 = vmatpush3.bf16.msra.mxu1 %v1693_v10 }
 0x3b3   : > { %1534 = vmatprep.subr.bf16.mxu1 %v1952_v12 }
 0x3b6   : > { %1535 = vmatpush3.bf16.msra.mxu1 %v1694_v11 }
 0x3b7   : > { %1536 = vmatprep.subr.bf16.mxu1 %v1952_v12 }
 0x3ba   : > { %1537 = vmatpush3.bf16.msra.mxu1 %v1695_v13 }
 0x3bb   : > { %1538 = vmatprep.subr.bf16.mxu1 %v1952_v12 }
 0x3be   : > { %1539 = vmatpush3.bf16.msra.mxu1 %v1696_v14 }
 0x3bf   : > { %1540 = vmatprep.subr.bf16.mxu1 %v1952_v12 }
 0x3c2   : > { %1541 = vmatpush3.bf16.msra.mxu1 %v1697_v19 }
 0x3c3   : > { %1566 = vmatprep.subr.bf16.mxu1 %v1952_v12 }
 0x478   : > { %v841_v61 = vpop.f32.mrb[0].mxu1 }
 0x479   : > { %v1518_v62 = vpop.f32.mrb[1].mxu1  ;;  %v848_v63 = vsel %vm847_vm5, %v841_v61, -inf }
 0x47a   : > { %849 = vmax.xlane.f32.xlu1 %v848_v63  ;;  %v844_v0 = vpop.f32.mrb[2].mxu1  ;;  %v1712_v62 = vld [vmem:[#allocation10 + $0x30] sm:$0xff]   ;;  %v1713_v63 = vld [vmem:[#allocation10 + $0x38] sm:$0xff]  }
 0x47b   : > { %v1519_v1 = vpop.f32.mrb[3].mxu1  ;;  %v1450_v0 = vld [vmem:[%s2460_s22] ss:$0 sm:$0xff]  ;;  %s1870_s22 = sshll.u32 %s1954_s14, 4  ;;  %s1871_s22 = int_to_ptr.vmem [resolvable:$false] %s1870_s22 }
 0x47c   : > { %s1872_s30 = scalar_lea.vmem %s1871_s22, 256  ;;  %p1873_p10 = scmp.lt.s32.totalorder %s2371_s10, %s1871_s22 }
 0x47d   : > { %p1874_p1 = scmp.lt.s32.totalorder %s1872_s30, %s1866_s23 }
 0x47f   : > { %p1875_p11 = por %p1874_p1, %p1873_p10 }
 0x481   : > { %p1876_p12 = pnand %p1875_p11, %p1869_p5 }
 0x507   : > { %v850_v2 = vpop.xlane.xlu1 %849 }
 0x508   : > { %v851_v3 = vsub.f32 %v841_v61, %v850_v2  ;;  %v1711_v61 = vld [vmem:[#allocation10 + $0x28] sm:$0xff]  }
 0x50a   : > { %v852_v4 = vmul.f32 1.442695, %v851_v3 }
 0x50c   : > { %1716 = vpow2.f32 %v852_v4 }
 0x516   : > { %v1717_v5 = vpop.eup %1716 }
 0x517   : > { %v854_v6 = vsel %vm847_vm5, %v1717_v5, 0.0 }
 0x518   : > { %855 = vadd.xlane.f32.xlu0 %v854_v6 }
 0x5a5   : > { %v856_v15 = vpop.xlane.xlu0 %855 }
 0x5a6   : > { %1718 = vrcp.f32 %v856_v15 }
 0x5b0   : > { %v1719_v16 = vpop.eup %1718 }
 0x5b1   : > { %v858_v17 = vmul.f32 %v1719_v16, %v1717_v5  ;;  %v1459_v16 = vld [vmem:[%s2461_s8] ss:$0 sm:$0xff] }
 0x5b3   : > { %v859_v18 = vpack.c.bf16 %v858_v17, %v858_v17 }
 0x5b5   : > { %1523 = vmatmul.mubr.msk.bf16.vlgmr.msra.gmra.mrb[12].mxu0 %vm847_vm5, %v859_v18 }
 0x5b6   : > { %1562 = vmatprep.mubr.msk.bf16.mxu0 %vm1953_vm1, %v1952_v12  ;;  %1547 = vmatpush3.bf16.msra.mxu0 %v1698_v33 }
 0x5b7   : > { %1548 = vmatprep.subr.bf16.mxu0 %v1952_v12 }
 0x5ba   : > { %1549 = vmatpush3.bf16.msra.mxu0 %v1699_v34 }
 0x5bb   : > { %1550 = vmatprep.subr.bf16.mxu0 %v1952_v12 }
 0x5be   : > { %1551 = vmatpush3.bf16.msra.mxu0 %v1700_v41 }
 0x5bf   : > { %1552 = vmatprep.subr.bf16.mxu0 %v1952_v12 }
 0x5c2   : > { %1553 = vmatpush3.bf16.msra.mxu0 %v1701_v42 }
 0x5c3   : > { %1554 = vmatprep.subr.bf16.mxu0 %v1952_v12 }
 0x5c6   : > { %1555 = vmatpush3.bf16.msra.mxu0 %v1702_v43 }
 0x5c7   : > { %1556 = vmatprep.subr.bf16.mxu0 %v1952_v12 }
 0x5ca   : > { %1557 = vmatpush3.bf16.msra.mxu0 %v1703_v26 }
 0x5cb   : > { %1558 = vmatprep.subr.bf16.mxu0 %v1952_v12 }
 0x5ce   : > { %1559 = vmatpush3.bf16.msra.mxu0 %v1704_v44 }
 0x5cf   : > { %1560 = vmatprep.subr.bf16.mxu0 %v1952_v12 }
 0x5d2   : > { %1561 = vmatpush3.bf16.msra.mxu0 %v1705_v45 }
 0x688   : > { %v902_v20 = vpop.f32.mrb[12].mxu0 }
 0x689   : > { %v908_v21 = vpack.c.bf16 %v902_v20, %v902_v20  ;;  %v1524_v22 = vpop.f32.mrb[13].mxu0 }
 0x68a   : > { %v905_v23 = vpop.f32.mrb[14].mxu0 }
 0x68b   : > { %v1525_v24 = vpop.f32.mrb[15].mxu0  ;;  %1543 = vmatmul.mubr.bf16.vlgmr.msra.gmra.mrb[4].mxu1 %v908_v21 }
 0x68c   : > { %1582 = vmatprep.mubr.msk.bf16.mxu1 %vm1953_vm1, %v1952_v12  ;;  %1567 = vmatpush3.bf16.msra.mxu1 %v1706_v56 }
 0x68d   : > { %1568 = vmatprep.subr.bf16.mxu1 %v1952_v12 }
 0x690   : > { %1569 = vmatpush3.bf16.msra.mxu1 %v1707_v57 }
 0x691   : > { %1570 = vmatprep.subr.bf16.mxu1 %v1952_v12 }
 0x694   : > { %1571 = vmatpush3.bf16.msra.mxu1 %v1708_v58 }
 0x695   : > { %1572 = vmatprep.subr.bf16.mxu1 %v1952_v12 }
 0x698   : > { %1573 = vmatpush3.bf16.msra.mxu1 %v1709_v59 }
 0x699   : > { %1574 = vmatprep.subr.bf16.mxu1 %v1952_v12 }
 0x69c   : > { %1575 = vmatpush3.bf16.msra.mxu1 %v1710_v60 }
 0x69d   : > { %1576 = vmatprep.subr.bf16.mxu1 %v1952_v12 }
 0x6a0   : > { %1577 = vmatpush3.bf16.msra.mxu1 %v1711_v61 }
 0x6a1   : > { %1578 = vmatprep.subr.bf16.mxu1 %v1952_v12 }
 0x6a4   : > { %1579 = vmatpush3.bf16.msra.mxu1 %v1712_v62 }
 0x6a5   : > { %1580 = vmatprep.subr.bf16.mxu1 %v1952_v12 }
 0x6a8   : > { %1581 = vmatpush3.bf16.msra.mxu1 %v1713_v63 }
 0x75e   : > { %v1014_v27 = vpop.f32.mrb[4].mxu1 }
 0x75f   : > { %v1015_v28 = vadd.f32 %v1439_v25, %v1014_v27  ;;  %v1544_v29 = vpop.f32.mrb[5].mxu1 }
 0x760   : > { %v1017_v30 = vpop.f32.mrb[6].mxu1 }
 0x761   : > { %v2331_v31 = vadd.f32 %v1015_v28, %v2298_v40  ;;  %v1545_v32 = vpop.f32.mrb[7].mxu1 }
 0x763   : > { %1021 = vadd.xlane.f32.xlu0 %v2331_v31 }
 0x7f0   : > { %v1022_v36 = vpop.xlane.xlu0 %1021 }
 0x7f1   : > { %v1023_v37 = vmul.f32 0.015625, %v1022_v36 }
 0x7f3   : > { %v1024_v38 = vsub.f32 %v2331_v31, %v1023_v37 }
 0x7f5   : > { %v1028_v39 = vsel %vm1027_vm6, %v1024_v38, 0.0 }
 0x7f6   : > { %v1029_v40 = vmul.f32 %v1028_v39, %v1028_v39 }
 0x7f8   : > { %1030 = vadd.xlane.f32.xlu0 %v1029_v40 }
 0x885   : > { %v1031_v46 = vpop.xlane.xlu0 %1030 }
 0x886   : > { %v1032_v47 = vmul.f32 0.015625, %v1031_v46 }
 0x888   : > { %v1033_v48 = vadd.f32 1e-05, %v1032_v47 }
 0x88a   : > { %1720 = vrsqrt.f32 %v1033_v48 }
 0x894   : > { %v1721_v49 = vpop.eup %1720 }
 0x895   : > { %v1035_v51 = vmul.f32 %v1721_v49, %v1028_v39 }
 0x897   : > { %v1043_v53 = vmul.f32 %v1448_v50, %v1035_v51 }
 0x899   : > { %v1051_v54 = vadd.f32 %v1449_v52, %v1043_v53 }
 0x89b   : > { %v1052_v55 = vpack.c.bf16 %v1051_v54, %v1051_v54 }
 0x89d   : > { %1563 = vmatmul.mubr.bf16.vlgmr.msra.gmra.mrb[16].mxu0 %v1052_v55 }
 0x970   : > { %v1158_v1 = vpop.f32.mrb[16].mxu0 }
 0x971   : > { %v1159_v2 = vadd.f32 %v1450_v0, %v1158_v1  ;;  %v1564_v3 = vpop.f32.mrb[17].mxu0 }
 0x972   : > { %v1161_v4 = vpop.f32.mrb[18].mxu0 }
 0x973   : > { %v1164_v5 = vmul.f32 %v1159_v2, %v1159_v2  ;;  %v1565_v6 = vpop.f32.mrb[19].mxu0 }
 0x975   : > { %v1165_v7 = vmul.f32 %v1164_v5, %v1159_v2 }
 0x977   : > { %v1166_v8 = vmul.f32 0.044715, %v1165_v7 }
 0x979   : > { %v1167_v9 = vadd.f32 %v1166_v8, %v1159_v2 }
 0x97b   : > { %v1168_v10 = vmul.f32 0.7978846, %v1167_v9 }
 0x97d   : > { %1722 = vtanh.f32 %v1168_v10 }
 0x987   : > { %v1723_v11 = vpop.eup %1722 }
 0x988   : > { %v1170_v12 = vadd.f32 1.0, %v1723_v11 }
 0x98a   : > { %v1171_v13 = vmul.f32 0.5, %v1170_v12 }
 0x98c   : > { %v1172_v14 = vmul.f32 %v1171_v13, %v1159_v2 }
 0x98e   : > { %v1173_v15 = vpack.c.bf16 %v1172_v14, %v1172_v14 }
 0x990   : > { %1583 = vmatmul.mubr.bf16.vlgmr.msra.gmra.mrb[8].mxu1 %v1173_v15 }
 0xa63   : > { %v1279_v17 = vpop.f32.mrb[8].mxu1 }
 0xa64   : > { %v1280_v18 = vadd.f32 %v1459_v16, %v1279_v17  ;;  %v1584_v19 = vpop.f32.mrb[9].mxu1 }
 0xa65   : > { %v1282_v20 = vpop.f32.mrb[10].mxu1 }
 0xa66   : > { %v1285_v21 = vadd.f32 %v1280_v18, %v2331_v31  ;;  %v1585_v22 = vpop.f32.mrb[11].mxu1 }
 0xa68   : > { %1287 = vst.msk [vmem:[%s567_s12] sm:$0xff] %vm1286_vm7, %v1285_v21 }
 0xa69   : > { %1879 = shalt.err (!%p1876_p12)
}
 0xa6a   : > { %s1880_s3 = scalar_lea.hbm %s2369_s29, 128  ;;  %s1884_s28 = scalar_lea.hbm %s2462_s9, 256 }
 0xa6b   : > { %p1881_p13 = scmp.ne.s32.totalorder %s2369_s29, %s1880_s3  ;;  %p1885_p9 = scmp.lt.u32.totalorder %s2369_s29, %s2462_s9 }
 0xa6c   : > { %p1886_p4 = scmp.lt.u32.totalorder %s1884_s28, %s1880_s3  ;;  %p1888_p6 = scmp.lt.u32.totalorder %s1880_s3, %s2369_s29 }
 0xa6d   : > { %p1882_p3 = pnand %p1881_p13, %p2463_p0 }
 0xa6e   : > { %p1887_p8 = por %p1886_p4, %p1885_p9 }
 0xa6f   : > { %p1883_p7 = pneg %p1882_p3 }
 0xa70   : > { %p1889_p2 = por %p1888_p6, %p1887_p8 }
 0xa72   : > { %p1890_p5 = pnand %p1889_p2, %p1883_p7 }
 0xa74   : > { %1893 = shalt.err (!%p1890_p5)
}
 0xa75   : > { %1604 = dma.vmem_to_hbm [thread:$0]  (%p2463_p0), %s2371_s10, 128, %s2369_s29, %s1289_s24  }
 0xa76 PF: > { %s1314_s5 = sand.u32 1, %s1928_s18   ;;  %p2464_p10 = scmp.ne.s32.totalorder %s2449_s27, 0 }
 0xa77   : > { %p2465_p1 = scmp.ge.s32.totalorder %s1940_s21, 2  ;;  %s1315_s23 = scalar_lea.sflag [#allocation4], %s1314_s5 }
 0xa79   : > { %p1624_p11 = pnand %p2465_p1, %p2464_p10 }
 0xa7b   : > { %1923 = dma.done.wait (!%p1624_p11), %s1315_s23, 128  }
 0xa7c   : > { %1925 = vsyncadd (!%p1624_p11), %s1315_s23, 4294967168  ;;  %p30_p12 = scmp.ge.s32.totalorder %s2180_s26, 4   ;;  %s2466_s18 = smov %s1932_s19 }
 0xa7d   : > { %s2467_s19 = smov %s1936_s20  ;;  %s2468_s20 = smov %s2191_s17 }
 0xa7e   : > { %s2469_s21 = smov %s2180_s26  ;;  %32 = sbr.rel (!%p30_p12) target bundleno = 16 (0x10), region = 141 }
 0xa85   :  { %1320 = vsyncpa [#allocation3], 1 }
 0xa86   :  { %1322 = vsyncpa [#allocation3 + $0x1], 1 }
 0xa87   :  { %1323 = vsyncpa [#allocation6], 1 }
 0xa88   :  { %1324 = vsyncpa [#allocation9], 1 }
 0xa89   :  { %1325 = vsyncpa [#allocation4], 1 }
 0xa8a   :  { %1327 = vsyncpa [#allocation4 + $0x1], 1 }

// kernel: tpu_custom_call.1
= control target key start
LH: loop header
LB: loop body
LE: loop exit
PB: predicated region body
PF: predicated region fallthrough
CT: control target
= control target key end

     0   :  { %s2413_s0 = inlined_call_operand.hbm [shape: f32[16,32], index: 0, kind: input, shape index: {}]   ;;  %s2414_s1 = inlined_call_operand.vmem [shape: f32[1,32], index: 1, kind: input, shape index: {}]   ;;  %s2415_s2 = inlined_call_operand.vmem [shape: f32[1,32], index: 2, kind: input, shape index: {}]   ;;  %s2416_s3 = inlined_call_operand.hbm [shape: bf16[32,384], index: 3, kind: input, shape index: {}]   ;;  %s2417_s4 = inlined_call_operand.vmem [shape: f32[1,384], index: 4, kind: input, shape index: {}]   ;;  %s2418_s5 = inlined_call_operand.vmem [shape: bf16[4,8], index: 5, kind: input, shape index: {}]   ;;  %s2419_s6 = inlined_call_operand.vmem [shape: f32[4,1], index: 6, kind: input, shape index: {}]   ;;  %s2420_s7 = inlined_call_operand.hbm [shape: bf16[128,128], index: 7, kind: input, shape index: {}]   ;;  %s2421_s8 = inlined_call_operand.vmem [shape: f32[1,128], index: 8, kind: input, shape index: {}]   ;;  %s2422_s9 = inlined_call_operand.vmem [shape: f32[1,128], index: 9, kind: input, shape index: {}]   ;;  %s2423_s10 = inlined_call_operand.vmem [shape: f32[1,128], index: 10, kind: input, shape index: {}]   ;;  %s2424_s11 = inlined_call_operand.hbm [shape: bf16[128,128], index: 11, kind: input, shape index: {}]   ;;  %s2425_s12 = inlined_call_operand.vmem [shape: f32[1,128], index: 12, kind: input, shape index: {}]   ;;  %s2426_s13 = inlined_call_operand.hbm [shape: bf16[128,128], index: 13, kind: input, shape index: {}]   ;;  %s2427_s14 = inlined_call_operand.vmem [shape: f32[1,128], index: 14, kind: input, shape index: {}]   ;;  %s2428_s15 = inlined_call_operand.hbm [shape: f32[16,64], index: 15, kind: output, shape index: {}]  }
   0x1   :  { %2433 = sst [smem:[#allocation16_spill]] %s2416_s3 }
   0x2   :  { %2434 = sst [smem:[#allocation17_spill]] %s2418_s5 }
   0x3   :  { %2435 = sst [smem:[#allocation18_spill]] %s2421_s8 }
   0x4   :  { %2436 = sst [smem:[#allocation19_spill]] %s2422_s9 }
   0x5   :  { %2437 = sst [smem:[#allocation20_spill]] %s2423_s10 }
   0x6   :  { %2438 = sst [smem:[#allocation21_spill]] %s2425_s12 }
   0x7   :  { %2439 = sst [smem:[#allocation22_spill]] %s2427_s14 }
   0x8   :  { %2440 = sst [smem:[#allocation23_spill]] %s2428_s15 }
   0x9   :  { %20 = vsyncpa [#allocation3], 0 }
   0xa   :  { %22 = vsyncpa [#allocation3 + $0x1], 0 }
   0xb   :  { %23 = vsyncpa [#allocation6], 0 }
   0xc   :  { %24 = vsyncpa [#allocation9], 0 }
   0xd   :  { %25 = vsyncpa [#allocation4], 0 }
   0xe   :  { %27 = vsyncpa [#allocation4 + $0x1], 0  ;;  %s2035_s18 = smov 0   ;;  %s2037_s19 = smov 0  }
   0xf   :  { %s2039_s20 = smov 0   ;;  %s2041_s21 = smov 0  }
  0x10 LB: > { %s1942_s22 = smov [#allocation5]   ;;  %s2056_s24 = sadd.s32 4294967295, %s1940_s21   ;;  %s1940_s21 = sphi %s2041_s21, %s2469_s21   ;;  %s1936_s20 = sphi %s2039_s20, %s2468_s20   ;;  %s1932_s19 = sphi %s2037_s19, %s2467_s19   ;;  %s1928_s18 = sphi %s2035_s18, %s2466_s18  }
  0x11   : > { %s402_s23 = sshll.u32 %s1942_s22, 4  ;;  %p1411_p0 = scmp.ge.s32.totalorder %s1940_s21, 1  ;;  %s2061_s23 = int_to_ptr.vmem [resolvable:$true] %s402_s23 }
  0x12   : > { %p2430_p1 = scmp.eq.s32.totalorder %s2056_s24, 0  ;;  %p384_p2 = scmp.lt.s32.totalorder %s1940_s21, 3 }
  0x13   : > { %s1943_s27 = smov [#allocation8]   ;;  %s1944_s29 = smov [#allocation7]  }
  0x14   : > { %p2063_p3 = pnand %p1411_p0, %p384_p2  ;;  %s446_s28 = sshll.u32 %s1943_s27, 4  ;;  %s2076_s28 = int_to_ptr.vmem [resolvable:$true] %s446_s28 }
  0x15   : > { %s2078_s30 = sshll.u32 %s1944_s29, 4  ;;  %s2443_s3 = sld [smem:[#allocation16_spill]]  ;;  %s425_s30 = int_to_ptr.vmem [resolvable:$true] %s2078_s30 }
  0x16   : > { %s2441_s25 = scalar_select %p2063_p3, 1, 0 }
  0x17   : > { %p1606_p5 = pneg %p2063_p3 }
  0x19   : > { %p2072_p6 = pnand %p1606_p5, %p2430_p1 }
  0x1b   : > { %s1724_s22 = scalar_lea.hbm %s2443_s3, 768  ;;  %p2088_p8 = pneg %p2072_p6 }
  0x1c   : > { %p1725_p7 = scmp.ne.s32.totalorder %s2443_s3, %s1724_s22  ;;  %p1731_p11 = scmp.lt.u32.totalorder %s1724_s22, %s2443_s3 }
  0x1e   : > { %p1727_p9 = pnand %p2088_p8, %p1725_p7 }
  0x20   : > { %p1728_p10 = pneg %p1727_p9 }
  0x22   : > { %p1733_p12 = pnand %p1731_p11, %p1728_p10 }
  0x24   : > { %1736 = shalt.err (!%p1733_p12)
}
  0x25   : > { %s1737_s14 = scalar_lea.vmem %s2061_s23, 768  ;;  %p1745_p5 = scmp.lt.s32.totalorder %s2061_s23, %s2061_s23 }
  0x26   : > { %p1738_p13 = scmp.ne.s32.totalorder %s2061_s23, %s1737_s14  ;;  %p1746_p4 = scmp.lt.s32.totalorder %s1737_s14, %s1737_s14 }
  0x28   : > { %p1740_p0 = pnand %p1738_p13, %p2088_p8  ;;  %p1747_p7 = por %p1746_p4, %p1745_p5 }
  0x2a   : > { %p1741_p2 = pneg %p1740_p0 }
  0x2c   : > { %p1748_p9 = pnand %p1747_p7, %p1741_p2 }
  0x2e   : > { %1751 = shalt.err (!%p1748_p9)
}
  0x2f   : > { %s1945_s15 = smov 192   ;;  %s1946_s16 = smov 12  }
  0x30   : > { %1609 = dma.hbm_to_vmem [thread:$0]  (!%p2072_p6), %s2443_s3, 768, %s2061_s23, [#allocation6], %s1945_s15, %s1945_s15, %s1946_s16  }
  0x31   : > { %s1752_s10 = scalar_lea.hbm %s2424_s11, 1024 }
  0x32   : > { %p1753_p4 = scmp.ne.s32.totalorder %s2424_s11, %s1752_s10  ;;  %p1759_p12 = scmp.lt.u32.totalorder %s1752_s10, %s2424_s11 }
  0x34   : > { %p1755_p10 = pnand %p1753_p4, %p2088_p8 }
  0x36   : > { %p1756_p11 = pneg %p1755_p10 }
  0x38   : > { %p1761_p13 = pnand %p1759_p12, %p1756_p11 }
  0x3a   : > { %1764 = shalt.err (!%p1761_p13)
}
  0x3b   : > { %s1765_s23 = scalar_lea.vmem %s2076_s28, 1024  ;;  %p1773_p7 = scmp.lt.s32.totalorder %s2076_s28, %s2076_s28 }
  0x3c   : > { %p1766_p0 = scmp.ne.s32.totalorder %s2076_s28, %s1765_s23  ;;  %p1774_p9 = scmp.lt.s32.totalorder %s1765_s23, %s1765_s23 }
  0x3e   : > { %p1768_p2 = pnand %p1766_p0, %p2088_p8  ;;  %p1775_p4 = por %p1774_p9, %p1773_p7 }
  0x40   : > { %p1769_p5 = pneg %p1768_p2 }
  0x42   : > { %p1776_p10 = pnand %p1775_p4, %p1769_p5 }
  0x44   : > { %1779 = shalt.err (!%p1776_p10)
}
  0x45   : > { %s1947_s8 = smov 64   ;;  %s1948_s5 = smov 4  }
  0x46   : > { %1615 = dma.hbm_to_vmem [thread:$0]  (!%p2072_p6), %s2424_s11, 1024, %s2076_s28, [#allocation9], %s1947_s8, %s1947_s8, %s1948_s5  }
  0x47   : > { %s1780_s17 = scalar_lea.hbm %s2420_s7, 1024 }
  0x48   : > { %p1781_p11 = scmp.ne.s32.totalorder %s2420_s7, %s1780_s17  ;;  %p1787_p0 = scmp.lt.u32.totalorder %s1780_s17, %s2420_s7 }
  0x4a   : > { %p1783_p12 = pnand %p1781_p11, %p2088_p8 }
  0x4c   : > { %p1784_p13 = pneg %p1783_p12 }
  0x4e   : > { %p1789_p2 = pnand %p1787_p0, %p1784_p13 }
  0x50   : > { %1792 = shalt.err (!%p1789_p2)
}
  0x51   : > { %s1793_s23 = scalar_lea.vmem %s425_s30, 1024  ;;  %p1801_p4 = scmp.lt.s32.totalorder %s425_s30, %s425_s30 }
  0x52   : > { %p1794_p5 = scmp.ne.s32.totalorder %s425_s30, %s1793_s23  ;;  %p1802_p10 = scmp.lt.s32.totalorder %s1793_s23, %s1793_s23 }
  0x54   : > { %p1796_p7 = pnand %p1794_p5, %p2088_p8  ;;  %p1803_p1 = por %p1802_p10, %p1801_p4 }
  0x56   : > { %p1797_p9 = pneg %p1796_p7 }
  0x58   : > { %p1804_p3 = pnand %p1803_p1, %p1797_p9 }
  0x5a   : > { %1807 = shalt.err (!%p1804_p3)
}
  0x5b   : > { %1612 = dma.hbm_to_vmem [thread:$0]  (!%p2072_p6), %s2420_s7, 1024, %s425_s30, [#allocation6], %s1947_s8, %s1947_s8, %s1948_s5  }
  0x5c   : > { %s1949_s10 = smov [#allocation10]   ;;  %s1808_s22 = scalar_lea.hbm %s2426_s13, 1024 }
  0x5d   : > { %s462_s15 = sshll.u32 %s1949_s10, 4  ;;  %p1809_p1 = scmp.ne.s32.totalorder %s2426_s13, %s1808_s22  ;;  %s463_s15 = int_to_ptr.vmem [resolvable:$true] %s462_s15 }
  0x5e   : > { %p1815_p12 = scmp.lt.u32.totalorder %s1808_s22, %s2426_s13 }
  0x5f   : > { %p1811_p3 = pnand %p1809_p1, %p2088_p8 }
  0x61   : > { %p1812_p11 = pneg %p1811_p3 }
  0x63   : > { %p1817_p13 = pnand %p1815_p12, %p1812_p11 }
  0x65   : > { %1820 = shalt.err (!%p1817_p13)
}
  0x66   : > { %s1821_s30 = scalar_lea.vmem %s463_s15, 1024  ;;  %p1829_p7 = scmp.lt.s32.totalorder %s463_s15, %s463_s15 }
  0x67   : > { %p1822_p0 = scmp.ne.s32.totalorder %s463_s15, %s1821_s30  ;;  %p1830_p9 = scmp.lt.s32.totalorder %s1821_s30, %s1821_s30 }
  0x69   : > { %p1824_p2 = pnand %p1822_p0, %p2088_p8  ;;  %p1831_p4 = por %p1830_p9, %p1829_p7 }
  0x6b   : > { %p1825_p5 = pneg %p1824_p2 }
  0x6d   : > { %p1832_p10 = pnand %p1831_p4, %p1825_p5 }
  0x6f   : > { %1835 = shalt.err (!%p1832_p10)
}
  0x70   : > { %1618 = dma.hbm_to_vmem [thread:$0]  (!%p2072_p6), %s2426_s13, 1024, %s463_s15, [#allocation9], %s1947_s8, %s1947_s8, %s1948_s5  }
  0x71   : > { %s1410_s12 = sadd.s32 4294967294, %s1940_s21   ;;  %s2180_s26 = sadd.s32 1, %s1940_s21  }
  0x72   : > { %s37_s10 = ssub.s32 %s1940_s21, %s2180_s26  ;;  %s40_s16 = sadd.s32 1, %s1936_s20 }
  0x73   : > { %p38_p8 = scmp.eq.s32.totalorder %s37_s10, 0  ;;  %p47_p1 = scmp.ne.s32.totalorder %s1936_s20, %s1932_s19 }
  0x74   : > { %p48_p3 = scmp.eq.s32.totalorder %s1940_s21, 0  ;;  %p53_p11 = scmp.ne.s32.totalorder %s1932_s19, %s1928_s18 }
  0x75   : > { %s2191_s17 = scalar_select %p38_p8, %s1936_s20, %s40_s16  }
  0x76   : > { %p2193_p12 = por %p48_p3, %p47_p1  ;;  %p2446_p13 = scmp.eq.s32.totalorder %s2056_s24, 0 }
  0x77   : > { %p371_p0 = scmp.eq.s32.totalorder %s2056_s24, 1  ;;  %p377_p2 = scmp.eq.s32.totalorder %s1410_s12, 1 }
  0x78   : > { %p2199_p6 = por %p2446_p13, %p53_p11  ;;  %p1631_p5 = scmp.lt.s32.totalorder %s1940_s21, 2 }
  0x79   : > { %s479_s5 = sand.u32 1, %s1936_s20   ;;  %p2206_p7 = por %p371_p0, %p47_p1 }
  0x7a   : > { %p2210_p9 = por %p377_p2, %p53_p11  ;;  %s1417_s29 = sshll.u32 %s479_s5, 3 }
  0x7b   : > { %s2448_s15 = scalar_select %p2206_p7, 1, 0 }
  0x7c   : > { %s2449_s27 = scalar_select %p2210_p9, 1, 0 }
  0x7d   : > { %s1418_s14 = sshll.u32 %s1940_s21, 7  ;;  %s483_s9 = scalar_lea.vmem [#allocation2], %s1417_s29 }
  0x7e   : > { %s2218_s28 = scalar_lea.hbm %s2413_s0, %s1418_s14  ;;  %s490_s12 = sshll.u32 %s483_s9, 4  ;;  %s2220_s12 = int_to_ptr.vmem [resolvable:$true] %s490_s12 }
  0x7f   : > { %p2224_p4 = pnand %p1631_p5, %p2193_p12  ;;  %s480_s16 = scalar_lea.sflag [#allocation3], %s479_s5 }
  0x80   : > { %s1836_s3 = scalar_lea.hbm %s2218_s28, 128  ;;  %s1841_s23 = scalar_lea.hbm %s2413_s0, 256 }
  0x81   : > { %p1837_p10 = scmp.ne.s32.totalorder %s2218_s28, %s1836_s3  ;;  %p1838_p8 = pneg %p2224_p4 }
  0x82   : > { %p1842_p11 = scmp.lt.u32.totalorder %s2218_s28, %s2413_s0  ;;  %p1843_p12 = scmp.lt.u32.totalorder %s1841_s23, %s1836_s3 }
  0x83   : > { %p1839_p1 = pnand %p1838_p8, %p1837_p10  ;;  %p1845_p0 = scmp.lt.u32.totalorder %s1836_s3, %s2218_s28 }
  0x84   : > { %p1844_p13 = por %p1843_p12, %p1842_p11 }
  0x85   : > { %p1840_p3 = pneg %p1839_p1 }
  0x86   : > { %p1846_p2 = por %p1845_p0, %p1844_p13 }
  0x88   : > { %p1847_p5 = pnand %p1846_p2, %p1840_p3 }
  0x8a   : > { %1850 = shalt.err (!%p1847_p5)
}
  0x8b   : > { %s1851_s5 = scalar_lea.vmem %s2220_s12, 128  ;;  %s1950_s9 = smov [#allocation2]  }
  0x8c   : > { %p1852_p10 = scmp.ne.s32.totalorder %s2220_s12, %s1851_s5  ;;  %s1856_s29 = sshll.u32 %s1950_s9, 4  ;;  %s1857_s29 = int_to_ptr.vmem [resolvable:$false] %s1856_s29 }
  0x8d   : > { %s1858_s14 = scalar_lea.vmem %s1857_s29, 256  ;;  %p1859_p7 = scmp.lt.s32.totalorder %s2220_s12, %s1857_s29 }
  0x8e   : > { %p1854_p1 = pnand %p1852_p10, %p1838_p8  ;;  %p1860_p11 = scmp.lt.s32.totalorder %s1858_s14, %s1851_s5 }
  0x90   : > { %p1855_p9 = pneg %p1854_p1  ;;  %p1861_p12 = por %p1860_p11, %p1859_p7 }
  0x92   : > { %p1862_p13 = pnand %p1861_p12, %p1855_p9 }
  0x94   : > { %1865 = shalt.err (!%p1862_p13)
}
  0x95   : > { %1622 = dma.hbm_to_vmem [thread:$0]  (!%p2224_p4), %s2218_s28, 128, %s2220_s12, %s480_s16  }
  0x96   : > { %p2451_p3 = scmp.ne.s32.totalorder %s2441_s25, 0 }
  0x97   : > { %s2256_s3 = sand.u32 (!%p2451_p3), 1, %s1932_s19  }
  0x98   : > { %499 = sbr.rel (%p2451_p3) target bundleno = 2678 (0xa76), region = 80  ;;  %s1420_s23 = sshll.u32 (!%p2451_p3), %s2256_s3, 3 }
  0x99   : > { %s502_s22 = scalar_lea.sflag (!%p2451_p3), [#allocation3], %s2256_s3  ;;  %s505_s30 = scalar_lea.vmem (!%p2451_p3), [#allocation2], %s1420_s23 }
  0x9f   : > { %1911 = dma.done.wait (%p2199_p6), %s502_s22, 128  }
  0xa0   : > { %1913 = vsyncadd (%p2199_p6), %s502_s22, 4294967168  ;;  %p2452_p7 = scmp.eq.s32.totalorder %s2056_s24, 0 }
  0xa2   : > { %1915 = dma.done.wait (%p2452_p7), [#allocation6], 1792   ;;  %p2453_p9 = pmov %p2452_p7 }
  0xa3   : > { %p2454_p4 = pmov %p2452_p7 }
  0xa4   : > { %1917 = vsyncadd (%p2453_p9), [#allocation6], 4294965504 }
  0xa5   : > { %1919 = dma.done.wait (%p2454_p4), [#allocation9], 2048   ;;  %p2455_p8 = pmov %p2454_p4 }
  0xa6   : > { %vm570_vm0 = vcmask 261120   ;;  %v569_v0 = vld [vmem:[%s505_s30] sm:$0xff]  ;;  %v1684_v8 = vld [vmem:[#allocation5] ss:$12 sps:$4 sm:$0xff]   ;;  %v1951_v10 = vmov 0   ;;  %v1952_v12 = vmov 0.0   ;;  %v611_v26 = vlaneseq }
  0xa7   : > { %1921 = vsyncadd (%p2455_p8), [#allocation9], 4294965248  ;;  %v571_v1 = vsel %vm570_vm0, %v569_v0, 0.0  ;;  %v1682_v7 = vld [vmem:[#allocation5 + $0x4] ss:$12 sps:$4 sm:$0xff]   ;;  %693 = vmatprep.mubr.bf16.mxu0 %v1951_v10  ;;  %1680 = vset.pattern.permute.xlu1 %v1951_v10  ;;  %vm1953_vm1 = vmmov 0  }
  0xa8   : > { %572 = vadd.xlane.f32.xlu0 %v571_v1  ;;  %v1685_v9 = vld [vmem:[#allocation5 + $0x1c] ss:$12 sps:$4 sm:$0xff]   ;;  %661 = vmatprep.subr.bf16.mxu0 %v1682_v7  ;;  %v1687_v11 = vld [vmem:[#allocation5 + $0x18] ss:$12 sps:$4 sm:$0xff]   ;;  %v1426_v17 = vld [vmem:[%s2414_s1] ss:$0 sm:$0xff] }
  0xa9   : > { %662 = vmatpush1.bf16.msra.mxu0 %v1684_v8  ;;  %1681 = vset.pattern.permute.xlu0 %v1951_v10  ;;  %v1427_v19 = vld [vmem:[%s2415_s2] ss:$0 sm:$0xff]  ;;  %v1688_v22 = vld [vmem:[#allocation5 + $0x8] ss:$12 sps:$4 sm:$0xff]   ;;  %v1689_v24 = vld [vmem:[#allocation5 + $0x20] ss:$12 sps:$4 sm:$0xff]  }
  0xaa   : > { %663 = vmatprep.subr.bf16.mxu0 %v1685_v9  ;;  %1514 = vmatprep.subr.bf16.mxu1 %v1952_v12  ;;  %v797_v25 = vld [vmem:[%s2419_s6] sm:$0xf]  ;;  %v612_v27 = vshrl.u32 %v611_v26, 7  ;;  %vm749_vm2 = vcmask 1043456   ;;  %s2456_s22 = sld [smem:[#allocation17_spill]]  ;;  %vm745_vm3 = vcmask 64512  }
  0xab   : > { %1516 = vmatprep.mubr.msk.bf16.mxu1 %vm1953_vm1, %v1952_v12  ;;  %800 = vperm.xlu1 %1680, %v797_v25   ;;  %v609_v29 = vld [vmem:[%s2417_s4] sm:$0x7]  ;;  %vm864_vm4 = vcmask 1041408   ;;  %vm847_vm5 = vcmask 31744   ;;  %v1691_v8 = vld [vmem:[#allocation7 + $0x8] sm:$0xff]   ;;  %v1692_v9 = vld [vmem:[#allocation7 + $0x10] sm:$0xff]  }
  0xac   : > { %v617_v28 = vsub.s32 1, %v612_v27  ;;  %v621_v33 = vsub.s32 2, %v612_v27  ;;  %v613_v47 = vsub.s32 0, %v612_v27  ;;  %v1690_v7 = vld [vmem:[#allocation7] sm:$0xff]   ;;  %s2457_s8 = sld [smem:[#allocation18_spill]]  ;;  %s2458_s10 = sld [smem:[#allocation19_spill]] }
  0xad   : > { %664 = vmatpush1.bf16.msra.mxu0 %v1687_v11  ;;  %v1694_v11 = vld [vmem:[#allocation7 + $0x20] sm:$0xff]   ;;  %s2459_s9 = sld [smem:[#allocation20_spill]]  ;;  %s1469_s28 = sshll.u32 %s2056_s24, 7  ;;  %vm1286_vm7 = vcmask 523264  }
  0xae   : > { %1506 = vmatprep.subr.bf16.mxu0 %v1952_v12  ;;  %v618_v31 = vrot.slane %v609_v29, %v617_v28  ;;  %v622_v37 = vrot.slane %v609_v29, %v621_v33  ;;  %v614_v52 = vrot.slane %v609_v29, %v613_v47  ;;  %v1698_v33 = vld [vmem:[#allocation8] sm:$0xff]   ;;  %s567_s12 = scalar_lea.vmem [#allocation11], %s1420_s23  ;;  %s1289_s24 = scalar_lea.sflag [#allocation4], %s2256_s3 }
  0xaf   : > { %p2463_p0 = scmp.ne.s32.totalorder %s2448_s15, 0  ;;  %s1954_s14 = smov [#allocation11]  }
  0xb0   : > { %v742_v46 = vld [vmem:[%s2456_s22] sm:$0x3]  ;;  %s2460_s22 = sld [smem:[#allocation21_spill]] }
  0xb2   : > { %v1439_v25 = vld [vmem:[%s2457_s8] ss:$0 sm:$0xff]  ;;  %s2461_s8 = sld [smem:[#allocation22_spill]] }
 0x12a   : > { %v801_v48 = vpop.permute.xlu1 %800 }
 0x135   : > { %v573_v2 = vpop.xlane.xlu0 %572 }
 0x136   : > { %v574_v3 = vmul.f32 0.03125, %v573_v2 }
 0x138   : > { %v575_v4 = vsub.f32 %v569_v0, %v574_v3 }
 0x13a   : > { %v576_v5 = vmul.f32 %v575_v4, %v575_v4 }
 0x13c   : > { %v577_v6 = vsel %vm570_vm0, %v576_v5, 0.0 }
 0x13d   : > { %578 = vadd.xlane.f32.xlu0 %v577_v6 }
 0x1ca   : > { %v579_v13 = vpop.xlane.xlu0 %578 }
 0x1cb   : > { %v580_v14 = vmul.f32 0.03125, %v579_v13  ;;  %v1695_v13 = vld [vmem:[#allocation7 + $0x28] sm:$0xff]  }
 0x1cd   : > { %v581_v15 = vadd.f32 1e-05, %v580_v14  ;;  %v1696_v14 = vld [vmem:[#allocation7 + $0x30] sm:$0xff]  }
 0x1cf   : > { %1714 = vrsqrt.f32 %v581_v15 }
 0x1d9   : > { %v1715_v16 = vpop.eup %1714 }
 0x1da   : > { %v583_v18 = vmul.f32 %v1715_v16, %v575_v4 }
 0x1dc   : > { %v591_v20 = vmul.f32 %v1426_v17, %v583_v18 }
 0x1de   : > { %v599_v21 = vadd.f32 %v1427_v19, %v591_v20  ;;  %v1697_v19 = vld [vmem:[#allocation7 + $0x38] sm:$0xff]  }
 0x1e0   : > { %v600_v23 = vpack.c.bf16 %v599_v21, %v599_v21 }
 0x1e2   : > { %1434 = vmatmul.mubr.msk.bf16.vlgmr.msra.gmra.mrb[0].mxu0 %vm570_vm0, %v600_v23 }
 0x1e3   : > { %1507 = vmatpush3.bf16.msra.mxu0 %v1688_v22  ;;  %1510 = vmatprep.mubr.msk.bf16.mxu0 %vm1953_vm1, %v1952_v12 }
 0x1e4   : > { %1508 = vmatprep.subr.bf16.mxu0 %v1952_v12 }
 0x1e7   : > { %1509 = vmatpush3.bf16.msra.mxu0 %v1689_v24 }
 0x1ea   : > { %1511 = vmatmul.mubr.msk.bf16.vlgmr.msra.gmra.mrb[4].mxu0 %vm570_vm0, %v600_v23 }
 0x1eb   : > { %788 = vmatprep.mubr.bf16.mxu0 %v1951_v10  ;;  %v1693_v10 = vld [vmem:[#allocation7 + $0x18] sm:$0xff]  }
 0x2b5   : > { %v695_v30 = vpop.f32.mrb[0].mxu0 }
 0x2b6   : > { %v697_v32 = vpop.f32.mrb[1].mxu0  ;;  %v696_v58 = vadd.f32 %v695_v30, %v614_v52  ;;  %v1449_v52 = vld [vmem:[%s2459_s9] ss:$0 sm:$0xff]  ;;  %s2462_s9 = sld [smem:[#allocation23_spill]] }
 0x2b7   : > { %v699_v34 = vpop.f32.mrb[2].mxu0  ;;  %v698_v36 = vadd.f32 %v697_v32, %v618_v31 }
 0x2b8   : > { %v700_v35 = vpop.f32.mrb[3].mxu0  ;;  %v805_v60 = vpack.c.bf16 %v696_v58, %v696_v58  ;;  %v1699_v34 = vld [vmem:[#allocation8 + $0x8] sm:$0xff]   ;;  %v1708_v58 = vld [vmem:[#allocation10 + $0x10] sm:$0xff]  }
 0x2b9   : > { %v743_v39 = vpack.c.bf16 %v698_v36, %v698_v36  ;;  %v1026_v35 = vand.u32 127, %v611_v26  ;;  %v1703_v26 = vld [vmem:[#allocation8 + $0x28] sm:$0xff]  }
 0x2bb   : > { %v751_v45 = vsel %vm749_vm2, %v743_v39, 0  ;;  %vm1027_vm6 = vcmp.lt.s32.totalorder %v1026_v35, 64 }
 0x2bc   : > { %s2369_s29 = scalar_lea.hbm %s2462_s9, %s1469_s28 }
 0x2bd   : > { %v736_v38 = vpop.f32.mrb[4].mxu0 }
 0x2be   : > { %v2298_v40 = vadd.f32 %v736_v38, %v622_v37  ;;  %v1512_v41 = vpop.f32.mrb[5].mxu0 }
 0x2bf   : > { %v739_v42 = vpop.f32.mrb[6].mxu0  ;;  %v1700_v41 = vld [vmem:[#allocation8 + $0x10] sm:$0xff]  }
 0x2c0   : > { %v744_v43 = vpack.c.bf16 %v2298_v40, %v2298_v40  ;;  %v1513_v44 = vpop.f32.mrb[7].mxu0  ;;  %v1701_v42 = vld [vmem:[#allocation8 + $0x18] sm:$0xff]  }
 0x2c1   : > { %v1704_v44 = vld [vmem:[#allocation8 + $0x30] sm:$0xff]  }
 0x2c2   : > { %1436 = vmatprep.subr.msk.bf16.mxu0 %vm749_vm2, %v744_v43  ;;  %v1702_v43 = vld [vmem:[#allocation8 + $0x20] sm:$0xff]  }
 0x2c3   : > { %757 = vmatpush1.bf16.msra.mxu0 %v751_v45  ;;  %v1705_v45 = vld [vmem:[#allocation8 + $0x38] sm:$0xff]  }
 0x2c4   : > { %1520 = vmatprep.subr.bf16.mxu0 %v1952_v12 }
 0x2c6   : > { %1437 = vmatmul.mubr.msk.bf16.vlgmr.msra.gmra.mrb[8].mxu0 %vm745_vm3, %v742_v46 }
 0x2c7   : > { %1522 = vmatprep.mubr.msk.bf16.mxu0 %vm1953_vm1, %v1952_v12 }
 0x399   : > { %v790_v49 = vpop.f32.mrb[8].mxu0 }
 0x39a   : > { %v803_v50 = vmul.f32 %v801_v48, %v790_v49  ;;  %v792_v51 = vpop.f32.mrb[9].mxu0 }
 0x39b   : > { %v804_v53 = vmul.f32 %v801_v48, %v792_v51  ;;  %v794_v54 = vpop.f32.mrb[10].mxu0 }
 0x39c   : > { %v806_v55 = vpack.c.bf16 %v803_v50, %v803_v50  ;;  %v795_v56 = vpop.f32.mrb[11].mxu0  ;;  %v1448_v50 = vld [vmem:[%s2458_s10] ss:$0 sm:$0xff]  ;;  %s1302_s10 = sshll.u32 %s567_s12, 4  ;;  %s2371_s10 = int_to_ptr.vmem [resolvable:$true] %s1302_s10 }
 0x39d   : > { %v860_v57 = vpack.c.bf16 %v804_v53, %v804_v53  ;;  %v1706_v56 = vld [vmem:[#allocation10] sm:$0xff]   ;;  %s1866_s23 = scalar_lea.vmem %s2371_s10, 128 }
 0x39e   : > { %1515 = vmatpush3.bf16.xpose.msra.mxu1 %v806_v55  ;;  %p1867_p6 = scmp.ne.s32.totalorder %s2371_s10, %s1866_s23 }
 0x39f   : > { %v866_v59 = vsel %vm864_vm4, %v860_v57, 0  ;;  %1526 = vmatprep.subr.bf16.mxu1 %v1952_v12  ;;  %v1707_v57 = vld [vmem:[#allocation10 + $0x8] sm:$0xff]  }
 0x3a0   : > { %1521 = vmatpush3.bf16.msra.mxu0 %v866_v59  ;;  %v1709_v59 = vld [vmem:[#allocation10 + $0x18] sm:$0xff]   ;;  %p1868_p2 = pnand %p1867_p6, %p2463_p0 }
 0x3a1   : > { %1546 = vmatprep.subr.bf16.mxu0 %v1952_v12 }
 0x3a2   : > { %p1869_p5 = pneg %p1868_p2 }
 0x3a5   : > { %1517 = vmatmul.mubr.bf16.vlgmr.msra.gmra.mrb[0].mxu1 %v805_v60  ;;  %v1710_v60 = vld [vmem:[#allocation10 + $0x20] sm:$0xff]  }
 0x3a6   : > { %1542 = vmatprep.mubr.msk.bf16.mxu1 %vm1953_vm1, %v1952_v12  ;;  %1527 = vmatpush3.bf16.msra.mxu1 %v1690_v7 }
 0x3a7   : > { %1528 = vmatprep.subr.bf16.mxu1 %v1952_v12 }
 0x3aa   : > { %1529 = vmatpush3.bf16.msra.mxu1 %v1691_v8 }
 0x3ab   : > { %1530 = vmatprep.subr.bf16.mxu1 %v1952_v12 }
 0x3ae   : > { %1531 = vmatpush3.bf16.msra.mxu1 %v1692_v9 }
 0x3af   : > { %1532 = vmatprep.subr.bf16.mxu1 %v1952_v12 }
 0x3b2   : > { %1533 = vmatpush3.bf16.msra.mxu1 %v1693_v10 }
 0x3b3   : > { %1534 = vmatprep.subr.bf16.mxu1 %v1952_v12 }
 0x3b6   : > { %1535 = vmatpush3.bf16.msra.mxu1 %v1694_v11 }
 0x3b7   : > { %1536 = vmatprep.subr.bf16.mxu1 %v1952_v12 }
 0x3ba   : > { %1537 = vmatpush3.bf16.msra.mxu1 %v1695_v13 }
 0x3bb   : > { %1538 = vmatprep.subr.bf16.mxu1 %v1952_v12 }
 0x3be   : > { %1539 = vmatpush3.bf16.msra.mxu1 %v1696_v14 }
 0x3bf   : > { %1540 = vmatprep.subr.bf16.mxu1 %v1952_v12 }
 0x3c2   : > { %1541 = vmatpush3.bf16.msra.mxu1 %v1697_v19 }
 0x3c3   : > { %1566 = vmatprep.subr.bf16.mxu1 %v1952_v12 }
 0x478   : > { %v841_v61 = vpop.f32.mrb[0].mxu1 }
 0x479   : > { %v1518_v62 = vpop.f32.mrb[1].mxu1  ;;  %v848_v63 = vsel %vm847_vm5, %v841_v61, -inf }
 0x47a   : > { %849 = vmax.xlane.f32.xlu1 %v848_v63  ;;  %v844_v0 = vpop.f32.mrb[2].mxu1  ;;  %v1712_v62 = vld [vmem:[#allocation10 + $0x30] sm:$0xff]   ;;  %v1713_v63 = vld [vmem:[#allocation10 + $0x38] sm:$0xff]  }
 0x47b   : > { %v1519_v1 = vpop.f32.mrb[3].mxu1  ;;  %v1450_v0 = vld [vmem:[%s2460_s22] ss:$0 sm:$0xff]  ;;  %s1870_s22 = sshll.u32 %s1954_s14, 4  ;;  %s1871_s22 = int_to_ptr.vmem [resolvable:$false] %s1870_s22 }
 0x47c   : > { %s1872_s30 = scalar_lea.vmem %s1871_s22, 256  ;;  %p1873_p10 = scmp.lt.s32.totalorder %s2371_s10, %s1871_s22 }
 0x47d   : > { %p1874_p1 = scmp.lt.s32.totalorder %s1872_s30, %s1866_s23 }
 0x47f   : > { %p1875_p11 = por %p1874_p1, %p1873_p10 }
 0x481   : > { %p1876_p12 = pnand %p1875_p11, %p1869_p5 }
 0x507   : > { %v850_v2 = vpop.xlane.xlu1 %849 }
 0x508   : > { %v851_v3 = vsub.f32 %v841_v61, %v850_v2  ;;  %v1711_v61 = vld [vmem:[#allocation10 + $0x28] sm:$0xff]  }
 0x50a   : > { %v852_v4 = vmul.f32 1.442695, %v851_v3 }
 0x50c   : > { %1716 = vpow2.f32 %v852_v4 }
 0x516   : > { %v1717_v5 = vpop.eup %1716 }
 0x517   : > { %v854_v6 = vsel %vm847_vm5, %v1717_v5, 0.0 }
 0x518   : > { %855 = vadd.xlane.f32.xlu0 %v854_v6 }
 0x5a5   : > { %v856_v15 = vpop.xlane.xlu0 %855 }
 0x5a6   : > { %1718 = vrcp.f32 %v856_v15 }
 0x5b0   : > { %v1719_v16 = vpop.eup %1718 }
 0x5b1   : > { %v858_v17 = vmul.f32 %v1719_v16, %v1717_v5  ;;  %v1459_v16 = vld [vmem:[%s2461_s8] ss:$0 sm:$0xff] }
 0x5b3   : > { %v859_v18 = vpack.c.bf16 %v858_v17, %v858_v17 }
 0x5b5   : > { %1523 = vmatmul.mubr.msk.bf16.vlgmr.msra.gmra.mrb[12].mxu0 %vm847_vm5, %v859_v18 }
 0x5b6   : > { %1562 = vmatprep.mubr.msk.bf16.mxu0 %vm1953_vm1, %v1952_v12  ;;  %1547 = vmatpush3.bf16.msra.mxu0 %v1698_v33 }
 0x5b7   : > { %1548 = vmatprep.subr.bf16.mxu0 %v1952_v12 }
 0x5ba   : > { %1549 = vmatpush3.bf16.msra.mxu0 %v1699_v34 }
 0x5bb   : > { %1550 = vmatprep.subr.bf16.mxu0 %v1952_v12 }
 0x5be   : > { %1551 = vmatpush3.bf16.msra.mxu0 %v1700_v41 }
 0x5bf   : > { %1552 = vmatprep.subr.bf16.mxu0 %v1952_v12 }
 0x5c2   : > { %1553 = vmatpush3.bf16.msra.mxu0 %v1701_v42 }
 0x5c3   : > { %1554 = vmatprep.subr.bf16.mxu0 %v1952_v12 }
 0x5c6   : > { %1555 = vmatpush3.bf16.msra.mxu0 %v1702_v43 }
 0x5c7   : > { %1556 = vmatprep.subr.bf16.mxu0 %v1952_v12 }
 0x5ca   : > { %1557 = vmatpush3.bf16.msra.mxu0 %v1703_v26 }
 0x5cb   : > { %1558 = vmatprep.subr.bf16.mxu0 %v1952_v12 }
 0x5ce   : > { %1559 = vmatpush3.bf16.msra.mxu0 %v1704_v44 }
 0x5cf   : > { %1560 = vmatprep.subr.bf16.mxu0 %v1952_v12 }
 0x5d2   : > { %1561 = vmatpush3.bf16.msra.mxu0 %v1705_v45 }
 0x688   : > { %v902_v20 = vpop.f32.mrb[12].mxu0 }
 0x689   : > { %v908_v21 = vpack.c.bf16 %v902_v20, %v902_v20  ;;  %v1524_v22 = vpop.f32.mrb[13].mxu0 }
 0x68a   : > { %v905_v23 = vpop.f32.mrb[14].mxu0 }
 0x68b   : > { %v1525_v24 = vpop.f32.mrb[15].mxu0  ;;  %1543 = vmatmul.mubr.bf16.vlgmr.msra.gmra.mrb[4].mxu1 %v908_v21 }
 0x68c   : > { %1582 = vmatprep.mubr.msk.bf16.mxu1 %vm1953_vm1, %v1952_v12  ;;  %1567 = vmatpush3.bf16.msra.mxu1 %v1706_v56 }
 0x68d   : > { %1568 = vmatprep.subr.bf16.mxu1 %v1952_v12 }
 0x690   : > { %1569 = vmatpush3.bf16.msra.mxu1 %v1707_v57 }
 0x691   : > { %1570 = vmatprep.subr.bf16.mxu1 %v1952_v12 }
 0x694   : > { %1571 = vmatpush3.bf16.msra.mxu1 %v1708_v58 }
 0x695   : > { %1572 = vmatprep.subr.bf16.mxu1 %v1952_v12 }
 0x698   : > { %1573 = vmatpush3.bf16.msra.mxu1 %v1709_v59 }
 0x699   : > { %1574 = vmatprep.subr.bf16.mxu1 %v1952_v12 }
 0x69c   : > { %1575 = vmatpush3.bf16.msra.mxu1 %v1710_v60 }
 0x69d   : > { %1576 = vmatprep.subr.bf16.mxu1 %v1952_v12 }
 0x6a0   : > { %1577 = vmatpush3.bf16.msra.mxu1 %v1711_v61 }
 0x6a1   : > { %1578 = vmatprep.subr.bf16.mxu1 %v1952_v12 }
 0x6a4   : > { %1579 = vmatpush3.bf16.msra.mxu1 %v1712_v62 }
 0x6a5   : > { %1580 = vmatprep.subr.bf16.mxu1 %v1952_v12 }
 0x6a8   : > { %1581 = vmatpush3.bf16.msra.mxu1 %v1713_v63 }
 0x75e   : > { %v1014_v27 = vpop.f32.mrb[4].mxu1 }
 0x75f   : > { %v1015_v28 = vadd.f32 %v1439_v25, %v1014_v27  ;;  %v1544_v29 = vpop.f32.mrb[5].mxu1 }
 0x760   : > { %v1017_v30 = vpop.f32.mrb[6].mxu1 }
 0x761   : > { %v2331_v31 = vadd.f32 %v1015_v28, %v2298_v40  ;;  %v1545_v32 = vpop.f32.mrb[7].mxu1 }
 0x763   : > { %1021 = vadd.xlane.f32.xlu0 %v2331_v31 }
 0x7f0   : > { %v1022_v36 = vpop.xlane.xlu0 %1021 }
 0x7f1   : > { %v1023_v37 = vmul.f32 0.015625, %v1022_v36 }
 0x7f3   : > { %v1024_v38 = vsub.f32 %v2331_v31, %v1023_v37 }
 0x7f5   : > { %v1028_v39 = vsel %vm1027_vm6, %v1024_v38, 0.0 }
 0x7f6   : > { %v1029_v40 = vmul.f32 %v1028_v39, %v1028_v39 }
 0x7f8   : > { %1030 = vadd.xlane.f32.xlu0 %v1029_v40 }
 0x885   : > { %v1031_v46 = vpop.xlane.xlu0 %1030 }
 0x886   : > { %v1032_v47 = vmul.f32 0.015625, %v1031_v46 }
 0x888   : > { %v1033_v48 = vadd.f32 1e-05, %v1032_v47 }
 0x88a   : > { %1720 = vrsqrt.f32 %v1033_v48 }
 0x894   : > { %v1721_v49 = vpop.eup %1720 }
 0x895   : > { %v1035_v51 = vmul.f32 %v1721_v49, %v1028_v39 }
 0x897   : > { %v1043_v53 = vmul.f32 %v1448_v50, %v1035_v51 }
 0x899   : > { %v1051_v54 = vadd.f32 %v1449_v52, %v1043_v53 }
 0x89b   : > { %v1052_v55 = vpack.c.bf16 %v1051_v54, %v1051_v54 }
 0x89d   : > { %1563 = vmatmul.mubr.bf16.vlgmr.msra.gmra.mrb[16].mxu0 %v1052_v55 }
 0x970   : > { %v1158_v1 = vpop.f32.mrb[16].mxu0 }
 0x971   : > { %v1159_v2 = vadd.f32 %v1450_v0, %v1158_v1  ;;  %v1564_v3 = vpop.f32.mrb[17].mxu0 }
 0x972   : > { %v1161_v4 = vpop.f32.mrb[18].mxu0 }
 0x973   : > { %v1164_v5 = vmul.f32 %v1159_v2, %v1159_v2  ;;  %v1565_v6 = vpop.f32.mrb[19].mxu0 }
 0x975   : > { %v1165_v7 = vmul.f32 %v1164_v5, %v1159_v2 }
 0x977   : > { %v1166_v8 = vmul.f32 0.044715, %v1165_v7 }
 0x979   : > { %v1167_v9 = vadd.f32 %v1166_v8, %v1159_v2 }
 0x97b   : > { %v1168_v10 = vmul.f32 0.7978846, %v1167_v9 }
 0x97d   : > { %1722 = vtanh.f32 %v1168_v10 }
 0x987   : > { %v1723_v11 = vpop.eup %1722 }
 0x988   : > { %v1170_v12 = vadd.f32 1.0, %v1723_v11 }
 0x98a   : > { %v1171_v13 = vmul.f32 0.5, %v1170_v12 }
 0x98c   : > { %v1172_v14 = vmul.f32 %v1171_v13, %v1159_v2 }
 0x98e   : > { %v1173_v15 = vpack.c.bf16 %v1172_v14, %v1172_v14 }
 0x990   : > { %1583 = vmatmul.mubr.bf16.vlgmr.msra.gmra.mrb[8].mxu1 %v1173_v15 }
 0xa63   : > { %v1279_v17 = vpop.f32.mrb[8].mxu1 }
 0xa64   : > { %v1280_v18 = vadd.f32 %v1459_v16, %v1279_v17  ;;  %v1584_v19 = vpop.f32.mrb[9].mxu1 }
 0xa65   : > { %v1282_v20 = vpop.f32.mrb[10].mxu1 }
 0xa66   : > { %v1285_v21 = vadd.f32 %v1280_v18, %v2331_v31  ;;  %v1585_v22 = vpop.f32.mrb[11].mxu1 }
 0xa68   : > { %1287 = vst.msk [vmem:[%s567_s12] sm:$0xff] %vm1286_vm7, %v1285_v21 }
 0xa69   : > { %1879 = shalt.err (!%p1876_p12)
}
 0xa6a   : > { %s1880_s3 = scalar_lea.hbm %s2369_s29, 128  ;;  %s1884_s28 = scalar_lea.hbm %s2462_s9, 256 }
 0xa6b   : > { %p1881_p13 = scmp.ne.s32.totalorder %s2369_s29, %s1880_s3  ;;  %p1885_p9 = scmp.lt.u32.totalorder %s2369_s29, %s2462_s9 }
 0xa6c   : > { %p1886_p4 = scmp.lt.u32.totalorder %s1884_s28, %s1880_s3  ;;  %p1888_p6 = scmp.lt.u32.totalorder %s1880_s3, %s2369_s29 }
 0xa6d   : > { %p1882_p3 = pnand %p1881_p13, %p2463_p0 }
 0xa6e   : > { %p1887_p8 = por %p1886_p4, %p1885_p9 }
 0xa6f   : > { %p1883_p7 = pneg %p1882_p3 }
 0xa70   : > { %p1889_p2 = por %p1888_p6, %p1887_p8 }
 0xa72   : > { %p1890_p5 = pnand %p1889_p2, %p1883_p7 }
 0xa74   : > { %1893 = shalt.err (!%p1890_p5)
}
 0xa75   : > { %1604 = dma.vmem_to_hbm [thread:$0]  (%p2463_p0), %s2371_s10, 128, %s2369_s29, %s1289_s24  }
 0xa76 PF: > { %s1314_s5 = sand.u32 1, %s1928_s18   ;;  %p2464_p10 = scmp.ne.s32.totalorder %s2449_s27, 0 }
 0xa77   : > { %p2465_p1 = scmp.ge.s32.totalorder %s1940_s21, 2  ;;  %s1315_s23 = scalar_lea.sflag [#allocation4], %s1314_s5 }
 0xa79   : > { %p1624_p11 = pnand %p2465_p1, %p2464_p10 }
 0xa7b   : > { %1923 = dma.done.wait (!%p1624_p11), %s1315_s23, 128  }
 0xa7c   : > { %1925 = vsyncadd (!%p1624_p11), %s1315_s23, 4294967168  ;;  %p30_p12 = scmp.ge.s32.totalorder %s2180_s26, 4   ;;  %s2466_s18 = smov %s1932_s19 }
 0xa7d   : > { %s2467_s19 = smov %s1936_s20  ;;  %s2468_s20 = smov %s2191_s17 }
 0xa7e   : > { %s2469_s21 = smov %s2180_s26  ;;  %32 = sbr.rel (!%p30_p12) target bundleno = 16 (0x10), region = 141 }
 0xa85   :  { %1320 = vsyncpa [#allocation3], 1 }
 0xa86   :  { %1322 = vsyncpa [#allocation3 + $0x1], 1 }
 0xa87   :  { %1323 = vsyncpa [#allocation6], 1 }
 0xa88   :  { %1324 = vsyncpa [#allocation9], 1 }
 0xa89   :  { %1325 = vsyncpa [#allocation4], 1 }
 0xa8a   :  { %1327 = vsyncpa [#allocation4 + $0x1], 1 }

</bundles_post_ra>
